<compile_context>
chip_gen: v7x
topology: tpu7x:2x2x1
jax: 0.10.0
libtpu: 0.0.40
codegen_flags: <defaults>
</compile_context>

<pallas_src>
import jax
import jax.numpy as jnp
import numpy as np
from jax import lax
from jax.experimental import pallas as pl
from jax.experimental.pallas import tpu as pltpu

LANE = 128


def _round_up(x, m):
    return ((x + m - 1) // m) * m


def _choose_tile_b(B, T, G):
    """Batch tile: fill MXU rows for large B, keep grid >= 2 (v7x megacore),
    and keep the time-major gate scratch (T, TILE_B, 4H) f32 under ~8 MiB."""
    tile = max(8, min(128, _round_up(max((B + 1) // 2, 1), 8)))
    while tile > 8 and T * tile * G * 4 > 8 * 1024 * 1024:
        tile = max(8, _round_up(tile // 2, 8))
    return tile


def _vmem_limit_bytes():
    try:
        kind = jax.devices()[0].device_kind.lower()
    except Exception:  # pragma: no cover
        kind = ""
    if "v7" in kind or "7x" in kind:
        return 48 * 1024 * 1024      # v7x: 64 MiB physical, leave pipeline headroom
    if "v5" in kind or "v6" in kind:
        return 64 * 1024 * 1024      # 128 MiB physical
    return 48 * 1024 * 1024          # unknown: conservative


# ----------------------------------------------------------------------------
# Fused kernel: all LSTM layers + heads, one pallas_call
# ----------------------------------------------------------------------------
def _make_fused_kernel(num_layers, T, H, unroll):
    G = 4 * H   # dense gate width (PyTorch order: i, f, g, o)

    def kernel(*refs):
        # refs = x, (wx, wh, b) * L, w_head, b_head, out, gates_sc, seq_a, seq_b
        x_ref = refs[0]
        layer_refs = [(refs[1 + 3 * l], refs[2 + 3 * l], refs[3 + 3 * l])
                      for l in range(num_layers)]
        idx = 1 + 3 * num_layers
        w_head_ref, b_head_ref = refs[idx], refs[idx + 1]
        out_ref = refs[idx + 2]
        gates_sc, seq_a, seq_b = refs[idx + 3], refs[idx + 4], refs[idx + 5]
        seq_bufs = (seq_a, seq_b)

        tb = x_ref.shape[1]   # time-major blocks: (T, tb, D)

        in_ref = x_ref
        h_last = None
        for l, (wx_ref, wh_ref, b_ref) in enumerate(layer_refs):
            is_last = (l == num_layers - 1)
            out_buf = seq_bufs[l % 2]

            # ---- hoisted input projection: one big bf16 MXU matmul, all steps
            d_l = in_ref.shape[-1]
            xin = in_ref[...].astype(jnp.bfloat16).reshape(T * tb, d_l)
            gx = jnp.dot(xin, wx_ref[...],
                         preferred_element_type=jnp.float32)       # (T*tb, G)
            gates_sc[...] = (gx + b_ref[...]).reshape(T, tb, G)

            # ---- recurrent weights resident across the whole time loop
            wh = wh_ref[...]                                        # (H, G) bf16

            # ---- serial time recurrence (only (tb,H)x(H,G) matmul + gates)
            def step(t, carry, out_buf=out_buf, wh=wh, is_last=is_last):
                h, c = carry
                pre = gates_sc[t] + jnp.dot(h.astype(jnp.bfloat16), wh,
                                            preferred_element_type=jnp.float32)
                # One EUP tanh for all 4 gates: sigmoid(z) = 0.5*tanh(0.5 z)+0.5;
                # the 'g' gate's weights/bias are pre-doubled in the packer so
                # tanh(x) = 2*sigmoid(2x) - 1.
                y = jnp.tanh(pre * 0.5) * 0.5 + 0.5
                i_g = y[:, 0 * H:1 * H]
                f_g = y[:, 1 * H:2 * H]
                g_g = 2.0 * y[:, 2 * H:3 * H] - 1.0
                o_g = y[:, 3 * H:4 * H]
                c_new = f_g * c + i_g * g_g
                h_new = o_g * jnp.tanh(c_new)
                if not is_last:   # last layer: only the final h is needed
                    out_buf[t] = h_new.astype(out_buf.dtype)
                return (h_new, c_new)

            h0 = jnp.zeros((tb, H), jnp.float32)
            c0 = jnp.zeros((tb, H), jnp.float32)
            h_last, _ = lax.fori_loop(0, T, step, (h0, c0), unroll=unroll)
            in_ref = out_buf

        # ---- heads: single lane-dense (tb, 128) output slab
        out_ref[...] = (jnp.dot(h_last.astype(jnp.bfloat16), w_head_ref[...],
                                preferred_element_type=jnp.float32)
                        + b_head_ref[...])

    return kernel


# ----------------------------------------------------------------------------
# Weight packing (transpose, dense gate layout, 'g'-gate doubling, bf16 cast)
# ----------------------------------------------------------------------------
def _gate_scale(H):
    # double the 'g' (cell-candidate) gate block -> single-tanh activation trick
    return jnp.concatenate([jnp.ones((2 * H,), jnp.float32),
                            jnp.full((H,), 2.0, jnp.float32),
                            jnp.ones((H,), jnp.float32)])


def _pack_gate_matrix(w, H, d_pad, dtype):
    """PyTorch (4H, D) -> transposed (D_pad, 4H), g-gate rows doubled, padded rows zero."""
    din = w.shape[1]
    w = w.astype(jnp.float32) * _gate_scale(H)[:, None]
    out = jnp.zeros((d_pad, 4 * H), jnp.float32).at[:din, :].set(w.T)
    return out.astype(dtype)


def _pack_gate_bias(b_ih, b_hh, H):
    b = (b_ih + b_hh).astype(jnp.float32) * _gate_scale(H)
    return b.reshape(1, 4 * H)


# ----------------------------------------------------------------------------
# Wrapper
# ----------------------------------------------------------------------------
def combined_lstm_forward(x, params):
    x = x.astype(jnp.float32)
    B, T, D_in = x.shape
    lstm_params = params["lstm"]
    num_layers = len(lstm_params)
    H = lstm_params[0][1].shape[1]
    G = 4 * H

    w_reg, b_reg = params["fc_regression"]
    w_cls, b_cls = params["fc_classification"]
    R, C = w_reg.shape[0], w_cls.shape[0]
    out_pad = _round_up(max(R + C, LANE), LANE)
    d0_pad = _round_up(max(D_in, LANE), LANE)     # lane-dense layer-0 input

    wdt = jnp.bfloat16   # MXU operand dtype (f32 accumulation in-kernel)

    # LSTM weights per layer: (D_l_pad, 4H) bf16, (H, 4H) bf16, (1, 4H) f32
    flat_w = []
    for l, (w_ih, w_hh, b_ih, b_hh) in enumerate(lstm_params):
        d_in_l = d0_pad if l == 0 else H
        flat_w.append(_pack_gate_matrix(w_ih, H, d_in_l, wdt))
        flat_w.append(_pack_gate_matrix(w_hh, H, H, wdt))
        flat_w.append(_pack_gate_bias(b_ih, b_hh, H))

    # heads packed into one lane-dense (H, out_pad) weight + (1, out_pad) bias
    w_cat = jnp.concatenate([w_reg, w_cls], axis=0).astype(jnp.float32)
    b_cat = jnp.concatenate([b_reg, b_cls], axis=0).astype(jnp.float32)
    w_head = jnp.zeros((H, out_pad), jnp.float32).at[:, :R + C].set(w_cat.T).astype(wdt)
    b_head = jnp.zeros((1, out_pad), jnp.float32).at[0, :R + C].set(b_cat)

    # batch tile: large for MXU fill, grid >= 2 so both v7x TCs get work
    TILE_B = _choose_tile_b(B, T, G)
    B_pad = max(_round_up(B, TILE_B), 2 * TILE_B)

    # time-major, batch-padded, lane-padded input: (T, B_pad, d0_pad)
    x_tm = jnp.zeros((T, B_pad, d0_pad), jnp.float32)
    x_tm = x_tm.at[:, :B, :D_in].set(jnp.transpose(x, (1, 0, 2)))

    in_specs = [pl.BlockSpec((T, TILE_B, d0_pad), lambda i: (0, i, 0))]
    for w in flat_w + [w_head, b_head]:
        nd = w.ndim
        in_specs.append(pl.BlockSpec(w.shape, lambda i, _nd=nd: (0,) * _nd))

    time_unroll = True if (TILE_B <= 16 and T <= 16) else 2
    kernel = _make_fused_kernel(num_layers, T, H, time_unroll)

    out = pl.pallas_call(
        kernel,
        out_shape=jax.ShapeDtypeStruct((B_pad, out_pad), jnp.float32),
        grid_spec=pltpu.PrefetchScalarGridSpec(
            num_scalar_prefetch=0,
            grid=(B_pad // TILE_B,),
            in_specs=in_specs,
            out_specs=pl.BlockSpec((TILE_B, out_pad), lambda i: (i, 0)),
            scratch_shapes=[
                pltpu.VMEM((T, TILE_B, G), jnp.float32),   # hoisted gates_x (time-major)
                pltpu.VMEM((T, TILE_B, H), jnp.float32),   # inter-layer seq (ping)
                pltpu.VMEM((T, TILE_B, H), jnp.float32),   # inter-layer seq (pong)
            ]),
        compiler_params=pltpu.CompilerParams(
            dimension_semantics=("parallel",),
            vmem_limit_bytes=_vmem_limit_bytes()),
    )(x_tm, *flat_w, w_head, b_head)

    reg = out[:B, :R]
    cls = out[:B, R:R + C]
    return reg, cls


# ----------------------------------------------------------------------------
# Deterministic parameter init (PyTorch-style uniform(-1/sqrt(H), 1/sqrt(H)))
# ----------------------------------------------------------------------------
def init_params(key, input_size, hidden_size, num_layers,
                num_classes, num_regression_outputs):
    bound = 1.0 / np.sqrt(hidden_size)

    def u(key, shape):
        return jax.random.uniform(key, shape, jnp.float32, -bound, bound)

    params = {"lstm": []}
    for layer in range(num_layers):
        d_in = input_size if layer == 0 else hidden_size
        key, k1, k2, k3, k4 = jax.random.split(key, 5)
        params["lstm"].append((
            u(k1, (4 * hidden_size, d_in)),          # weight_ih_l{k}
            u(k2, (4 * hidden_size, hidden_size)),   # weight_hh_l{k}
            u(k3, (4 * hidden_size,)),               # bias_ih_l{k}
            u(k4, (4 * hidden_size,)),               # bias_hh_l{k}
        ))
    key, k1, k2, k3, k4 = jax.random.split(key, 5)
    params["fc_regression"] = (u(k1, (num_regression_outputs, hidden_size)),
                               u(k2, (num_regression_outputs,)))
    params["fc_classification"] = (u(k3, (num_classes, hidden_size)),
                                   u(k4, (num_classes,)))
    return params


# ----------------------------------------------------------------------------
# Pure-JAX f32 reference (correctness check)
# ----------------------------------------------------------------------------
def reference_forward(x, params):
    out = x
    for (w_ih, w_hh, b_ih, b_hh) in params["lstm"]:
        B, T, _ = out.shape
        H = w_hh.shape[1]
        h = jnp.zeros((B, H), jnp.float32)
        c = jnp.zeros((B, H), jnp.float32)
        hs = []
        for t in range(T):
            gates = out[:, t, :] @ w_ih.T + h @ w_hh.T + b_ih + b_hh
            i_g = jax.nn.sigmoid(gates[:, 0 * H:1 * H])
            f_g = jax.nn.sigmoid(gates[:, 1 * H:2 * H])
            g_g = jnp.tanh(gates[:, 2 * H:3 * H])
            o_g = jax.nn.sigmoid(gates[:, 3 * H:4 * H])
            c = f_g * c + i_g * g_g
            h = o_g * jnp.tanh(c)
            hs.append(h)
        out = jnp.stack(hs, axis=1)
    last = out[:, -1, :]
    w_reg, b_reg = params["fc_regression"]
    w_cls, b_cls = params["fc_classification"]
    return last @ w_reg.T + b_reg, last @ w_cls.T + b_cls


# ----------------------------------------------------------------------------
if __name__ == "__main__":
    batch, seq = 2, 8
    input_size, hidden_size, num_layers = 4, 32, 2
    num_classes, num_regression_outputs = 3, 2

    key = jax.random.PRNGKey(0)
    key, kp, kx = jax.random.split(key, 3)
    params = init_params(kp, input_size, hidden_size, num_layers,
                         num_classes, num_regression_outputs)
    x = jax.random.normal(kx, (batch, seq, input_size), jnp.float32)

    fwd = jax.jit(combined_lstm_forward)
    reg, cls = jax.block_until_ready(fwd(x, params))

    # bf16 MXU operands (f32 accumulate) -> loosened tolerance vs f32 reference
    reg_ref, cls_ref = reference_forward(x, params)
    np.testing.assert_allclose(np.asarray(reg), np.asarray(reg_ref),
                               rtol=5e-2, atol=5e-2)
    np.testing.assert_allclose(np.asarray(cls), np.asarray(cls_ref),
                               rtol=5e-2, atol=5e-2)

    assert reg.shape == (batch, num_regression_outputs)
    assert cls.shape == (batch, num_classes)
    print("KERNEL_OK")
</pallas_src>

<mosaic_0001>
module attributes {stable_mosaic.version = 11 : i64} {
  func.func @kernel(%arg0: i32, %arg1: memref<8x8x128xf32, #tpu.memory_space<vmem>>, %arg2: memref<128x128xbf16, #tpu.memory_space<vmem>>, %arg3: memref<32x128xbf16, #tpu.memory_space<vmem>>, %arg4: memref<1x128xf32, #tpu.memory_space<vmem>>, %arg5: memref<32x128xbf16, #tpu.memory_space<vmem>>, %arg6: memref<32x128xbf16, #tpu.memory_space<vmem>>, %arg7: memref<1x128xf32, #tpu.memory_space<vmem>>, %arg8: memref<32x128xbf16, #tpu.memory_space<vmem>>, %arg9: memref<1x128xf32, #tpu.memory_space<vmem>>, %arg10: memref<8x128xf32, #tpu.memory_space<vmem>>, %arg11: memref<8x8x128xf32, #tpu.memory_space<vmem>>, %arg12: memref<8x8x32xf32, #tpu.memory_space<vmem>>, %arg13: memref<8x8x32xf32, #tpu.memory_space<vmem>>) attributes {dimension_semantics = [#tpu.dimension_semantics<parallel>], iteration_bounds = array<i64: 2>, scalar_prefetch = 0 : i64, scratch_operands = 3 : i64, tpu.core_type = #tpu.core_type<tc>, window_params = [{transform_indices = @transform_0, window_bounds = array<i64: 8, 8, 128>}, {pipeline_mode = #tpu.pipeline_mode<synchronous>, transform_indices = @transform_1, window_bounds = array<i64: 128, 128>}, {pipeline_mode = #tpu.pipeline_mode<synchronous>, transform_indices = @transform_2, window_bounds = array<i64: 32, 128>}, {pipeline_mode = #tpu.pipeline_mode<synchronous>, transform_indices = @transform_3, window_bounds = array<i64: 1, 128>}, {pipeline_mode = #tpu.pipeline_mode<synchronous>, transform_indices = @transform_4, window_bounds = array<i64: 32, 128>}, {pipeline_mode = #tpu.pipeline_mode<synchronous>, transform_indices = @transform_5, window_bounds = array<i64: 32, 128>}, {pipeline_mode = #tpu.pipeline_mode<synchronous>, transform_indices = @transform_6, window_bounds = array<i64: 1, 128>}, {pipeline_mode = #tpu.pipeline_mode<synchronous>, transform_indices = @transform_7, window_bounds = array<i64: 32, 128>}, {pipeline_mode = #tpu.pipeline_mode<synchronous>, transform_indices = @transform_8, window_bounds = array<i64: 1, 128>}, {transform_indices = @transform_9, window_bounds = array<i64: 8, 128>}]} {
    %c0 = arith.constant 0 : index
    %c0_0 = arith.constant 0 : index
    %c0_1 = arith.constant 0 : index
    %0 = vector.load %arg1[%c0, %c0_0, %c0_1] : memref<8x8x128xf32, #tpu.memory_space<vmem>>, vector<8x8x128xf32>
    %1 = arith.truncf %0 : vector<8x8x128xf32> to vector<8x8x128xbf16>
    %2 = vector.shape_cast %1 : vector<8x8x128xbf16> to vector<64x128xbf16>
    %c0_2 = arith.constant 0 : index
    %c0_3 = arith.constant 0 : index
    %3 = vector.load %arg2[%c0_2, %c0_3] : memref<128x128xbf16, #tpu.memory_space<vmem>>, vector<128x128xbf16>
    %cst = arith.constant dense<0.000000e+00> : vector<64x128xf32>
    %4 = tpu.matmul %2, %3, %cst {dimension_numbers = #tpu.dot_dimension_numbers<[1], [0], [0], [1], [0, 0, 1, 1], [], []>} : vector<64x128xbf16>, vector<128x128xbf16>, vector<64x128xf32> -> vector<64x128xf32>
    %c0_4 = arith.constant 0 : index
    %c0_5 = arith.constant 0 : index
    %5 = vector.load %arg4[%c0_4, %c0_5] : memref<1x128xf32, #tpu.memory_space<vmem>>, vector<1x128xf32>
    %6 = vector.broadcast %5 : vector<1x128xf32> to vector<64x128xf32>
    %7 = arith.addf %4, %6 : vector<64x128xf32>
    %8 = vector.shape_cast %7 : vector<64x128xf32> to vector<8x8x128xf32>
    %c0_6 = arith.constant 0 : index
    %c0_7 = arith.constant 0 : index
    %c0_8 = arith.constant 0 : index
    %9 = vector.load %arg11[%c0_6, %c0_7, %c0_8] : memref<8x8x128xf32, #tpu.memory_space<vmem>>, vector<8x8x128xf32>
    tpu.vector_store %arg11[%c0_6, %c0_7, %c0_8], %8 {strides = array<i32>} : memref<8x8x128xf32, #tpu.memory_space<vmem>>, vector<8x8x128xf32>,
    %c0_9 = arith.constant 0 : index
    %c0_10 = arith.constant 0 : index
    %10 = vector.load %arg3[%c0_9, %c0_10] : memref<32x128xbf16, #tpu.memory_space<vmem>>, vector<32x128xbf16>
    %cst_11 = arith.constant 0.000000e+00 : f32
    %11 = vector.broadcast %cst_11 : f32 to vector<8x32xf32>
    %cst_12 = arith.constant 0.000000e+00 : f32
    %12 = vector.broadcast %cst_12 : f32 to vector<8x32xf32>
    %c0_i32 = arith.constant 0 : i32
    %13 = arith.index_cast %c0_i32 : i32 to index
    %c0_13 = arith.constant 0 : index
    %c0_14 = arith.constant 0 : index
    %14 = vector.load %arg11[%13, %c0_13, %c0_14] : memref<8x8x128xf32, #tpu.memory_space<vmem>>, vector<1x8x128xf32>
    %15 = vector.shape_cast %14 : vector<1x8x128xf32> to vector<8x128xf32>
    %16 = arith.truncf %11 : vector<8x32xf32> to vector<8x32xbf16>
    %cst_15 = arith.constant dense<0.000000e+00> : vector<8x128xf32>
    %17 = tpu.matmul %16, %10, %cst_15 {dimension_numbers = #tpu.dot_dimension_numbers<[1], [0], [0], [1], [0, 0, 1, 1], [], []>} : vector<8x32xbf16>, vector<32x128xbf16>, vector<8x128xf32> -> vector<8x128xf32>
    %18 = arith.addf %15, %17 : vector<8x128xf32>
    %cst_16 = arith.constant 5.000000e-01 : f32
    %19 = vector.broadcast %cst_16 : f32 to vector<8x128xf32>
    %20 = arith.mulf %18, %19 : vector<8x128xf32>
    %21 = math.tanh %20 : vector<8x128xf32>
    %cst_17 = arith.constant 5.000000e-01 : f32
    %22 = vector.broadcast %cst_17 : f32 to vector<8x128xf32>
    %23 = arith.mulf %21, %22 : vector<8x128xf32>
    %cst_18 = arith.constant 5.000000e-01 : f32
    %24 = vector.broadcast %cst_18 : f32 to vector<8x128xf32>
    %25 = arith.addf %23, %24 : vector<8x128xf32>
    %26 = vector.extract_strided_slice %25 {offsets = [0, 0], sizes = [8, 32], strides = [1, 1]} : vector<8x128xf32> to vector<8x32xf32>
    %27 = vector.extract_strided_slice %25 {offsets = [0, 32], sizes = [8, 32], strides = [1, 1]} : vector<8x128xf32> to vector<8x32xf32>
    %28 = vector.extract_strided_slice %25 {offsets = [0, 64], sizes = [8, 32], strides = [1, 1]} : vector<8x128xf32> to vector<8x32xf32>
    %cst_19 = arith.constant 2.000000e+00 : f32
    %29 = vector.broadcast %cst_19 : f32 to vector<8x32xf32>
    %30 = arith.mulf %29, %28 : vector<8x32xf32>
    %cst_20 = arith.constant 1.000000e+00 : f32
    %31 = vector.broadcast %cst_20 : f32 to vector<8x32xf32>
    %32 = arith.subf %30, %31 : vector<8x32xf32>
    %33 = vector.extract_strided_slice %25 {offsets = [0, 96], sizes = [8, 32], strides = [1, 1]} : vector<8x128xf32> to vector<8x32xf32>
    %34 = arith.mulf %27, %12 : vector<8x32xf32>
    %35 = arith.mulf %26, %32 : vector<8x32xf32>
    %36 = arith.addf %34, %35 : vector<8x32xf32>
    %37 = math.tanh %36 : vector<8x32xf32>
    %38 = arith.mulf %33, %37 : vector<8x32xf32>
    %39 = arith.index_cast %c0_i32 : i32 to index
    %c0_21 = arith.constant 0 : index
    %c0_22 = arith.constant 0 : index
    %40 = vector.load %arg12[%39, %c0_21, %c0_22] : memref<8x8x32xf32, #tpu.memory_space<vmem>>, vector<1x8x32xf32>
    %41 = vector.shape_cast %40 : vector<1x8x32xf32> to vector<8x32xf32>
    %42 = vector.shape_cast %38 : vector<8x32xf32> to vector<1x8x32xf32>
    tpu.vector_store %arg12[%39, %c0_21, %c0_22], %42 {strides = array<i32>} : memref<8x8x32xf32, #tpu.memory_space<vmem>>, vector<1x8x32xf32>,
    %c1_i32 = arith.constant 1 : i32
    %43 = arith.index_cast %c1_i32 : i32 to index
    %c0_23 = arith.constant 0 : index
    %c0_24 = arith.constant 0 : index
    %44 = vector.load %arg11[%43, %c0_23, %c0_24] : memref<8x8x128xf32, #tpu.memory_space<vmem>>, vector<1x8x128xf32>
    %45 = vector.shape_cast %44 : vector<1x8x128xf32> to vector<8x128xf32>
    %46 = arith.truncf %38 : vector<8x32xf32> to vector<8x32xbf16>
    %cst_25 = arith.constant dense<0.000000e+00> : vector<8x128xf32>
    %47 = tpu.matmul %46, %10, %cst_25 {dimension_numbers = #tpu.dot_dimension_numbers<[1], [0], [0], [1], [0, 0, 1, 1], [], []>} : vector<8x32xbf16>, vector<32x128xbf16>, vector<8x128xf32> -> vector<8x128xf32>
    %48 = arith.addf %45, %47 : vector<8x128xf32>
    %cst_26 = arith.constant 5.000000e-01 : f32
    %49 = vector.broadcast %cst_26 : f32 to vector<8x128xf32>
    %50 = arith.mulf %48, %49 : vector<8x128xf32>
    %51 = math.tanh %50 : vector<8x128xf32>
    %cst_27 = arith.constant 5.000000e-01 : f32
    %52 = vector.broadcast %cst_27 : f32 to vector<8x128xf32>
    %53 = arith.mulf %51, %52 : vector<8x128xf32>
    %cst_28 = arith.constant 5.000000e-01 : f32
    %54 = vector.broadcast %cst_28 : f32 to vector<8x128xf32>
    %55 = arith.addf %53, %54 : vector<8x128xf32>
    %56 = vector.extract_strided_slice %55 {offsets = [0, 0], sizes = [8, 32], strides = [1, 1]} : vector<8x128xf32> to vector<8x32xf32>
    %57 = vector.extract_strided_slice %55 {offsets = [0, 32], sizes = [8, 32], strides = [1, 1]} : vector<8x128xf32> to vector<8x32xf32>
    %58 = vector.extract_strided_slice %55 {offsets = [0, 64], sizes = [8, 32], strides = [1, 1]} : vector<8x128xf32> to vector<8x32xf32>
    %cst_29 = arith.constant 2.000000e+00 : f32
    %59 = vector.broadcast %cst_29 : f32 to vector<8x32xf32>
    %60 = arith.mulf %59, %58 : vector<8x32xf32>
    %cst_30 = arith.constant 1.000000e+00 : f32
    %61 = vector.broadcast %cst_30 : f32 to vector<8x32xf32>
    %62 = arith.subf %60, %61 : vector<8x32xf32>
    %63 = vector.extract_strided_slice %55 {offsets = [0, 96], sizes = [8, 32], strides = [1, 1]} : vector<8x128xf32> to vector<8x32xf32>
    %64 = arith.mulf %57, %36 : vector<8x32xf32>
    %65 = arith.mulf %56, %62 : vector<8x32xf32>
    %66 = arith.addf %64, %65 : vector<8x32xf32>
    %67 = math.tanh %66 : vector<8x32xf32>
    %68 = arith.mulf %63, %67 : vector<8x32xf32>
    %69 = arith.index_cast %c1_i32 : i32 to index
    %c0_31 = arith.constant 0 : index
    %c0_32 = arith.constant 0 : index
    %70 = vector.load %arg12[%69, %c0_31, %c0_32] : memref<8x8x32xf32, #tpu.memory_space<vmem>>, vector<1x8x32xf32>
    %71 = vector.shape_cast %70 : vector<1x8x32xf32> to vector<8x32xf32>
    %72 = vector.shape_cast %68 : vector<8x32xf32> to vector<1x8x32xf32>
    tpu.vector_store %arg12[%69, %c0_31, %c0_32], %72 {strides = array<i32>} : memref<8x8x32xf32, #tpu.memory_space<vmem>>, vector<1x8x32xf32>,
    %c2_i32 = arith.constant 2 : i32
    %73 = arith.index_cast %c2_i32 : i32 to index
    %c0_33 = arith.constant 0 : index
    %c0_34 = arith.constant 0 : index
    %74 = vector.load %arg11[%73, %c0_33, %c0_34] : memref<8x8x128xf32, #tpu.memory_space<vmem>>, vector<1x8x128xf32>
    %75 = vector.shape_cast %74 : vector<1x8x128xf32> to vector<8x128xf32>
    %76 = arith.truncf %68 : vector<8x32xf32> to vector<8x32xbf16>
    %cst_35 = arith.constant dense<0.000000e+00> : vector<8x128xf32>
    %77 = tpu.matmul %76, %10, %cst_35 {dimension_numbers = #tpu.dot_dimension_numbers<[1], [0], [0], [1], [0, 0, 1, 1], [], []>} : vector<8x32xbf16>, vector<32x128xbf16>, vector<8x128xf32> -> vector<8x128xf32>
    %78 = arith.addf %75, %77 : vector<8x128xf32>
    %cst_36 = arith.constant 5.000000e-01 : f32
    %79 = vector.broadcast %cst_36 : f32 to vector<8x128xf32>
    %80 = arith.mulf %78, %79 : vector<8x128xf32>
    %81 = math.tanh %80 : vector<8x128xf32>
    %cst_37 = arith.constant 5.000000e-01 : f32
    %82 = vector.broadcast %cst_37 : f32 to vector<8x128xf32>
    %83 = arith.mulf %81, %82 : vector<8x128xf32>
    %cst_38 = arith.constant 5.000000e-01 : f32
    %84 = vector.broadcast %cst_38 : f32 to vector<8x128xf32>
    %85 = arith.addf %83, %84 : vector<8x128xf32>
    %86 = vector.extract_strided_slice %85 {offsets = [0, 0], sizes = [8, 32], strides = [1, 1]} : vector<8x128xf32> to vector<8x32xf32>
    %87 = vector.extract_strided_slice %85 {offsets = [0, 32], sizes = [8, 32], strides = [1, 1]} : vector<8x128xf32> to vector<8x32xf32>
    %88 = vector.extract_strided_slice %85 {offsets = [0, 64], sizes = [8, 32], strides = [1, 1]} : vector<8x128xf32> to vector<8x32xf32>
    %cst_39 = arith.constant 2.000000e+00 : f32
    %89 = vector.broadcast %cst_39 : f32 to vector<8x32xf32>
    %90 = arith.mulf %89, %88 : vector<8x32xf32>
    %cst_40 = arith.constant 1.000000e+00 : f32
    %91 = vector.broadcast %cst_40 : f32 to vector<8x32xf32>
    %92 = arith.subf %90, %91 : vector<8x32xf32>
    %93 = vector.extract_strided_slice %85 {offsets = [0, 96], sizes = [8, 32], strides = [1, 1]} : vector<8x128xf32> to vector<8x32xf32>
    %94 = arith.mulf %87, %66 : vector<8x32xf32>
    %95 = arith.mulf %86, %92 : vector<8x32xf32>
    %96 = arith.addf %94, %95 : vector<8x32xf32>
    %97 = math.tanh %96 : vector<8x32xf32>
    %98 = arith.mulf %93, %97 : vector<8x32xf32>
    %99 = arith.index_cast %c2_i32 : i32 to index
    %c0_41 = arith.constant 0 : index
    %c0_42 = arith.constant 0 : index
    %100 = vector.load %arg12[%99, %c0_41, %c0_42] : memref<8x8x32xf32, #tpu.memory_space<vmem>>, vector<1x8x32xf32>
    %101 = vector.shape_cast %100 : vector<1x8x32xf32> to vector<8x32xf32>
    %102 = vector.shape_cast %98 : vector<8x32xf32> to vector<1x8x32xf32>
    tpu.vector_store %arg12[%99, %c0_41, %c0_42], %102 {strides = array<i32>} : memref<8x8x32xf32, #tpu.memory_space<vmem>>, vector<1x8x32xf32>,
    %c3_i32 = arith.constant 3 : i32
    %103 = arith.index_cast %c3_i32 : i32 to index
    %c0_43 = arith.constant 0 : index
    %c0_44 = arith.constant 0 : index
    %104 = vector.load %arg11[%103, %c0_43, %c0_44] : memref<8x8x128xf32, #tpu.memory_space<vmem>>, vector<1x8x128xf32>
    %105 = vector.shape_cast %104 : vector<1x8x128xf32> to vector<8x128xf32>
    %106 = arith.truncf %98 : vector<8x32xf32> to vector<8x32xbf16>
    %cst_45 = arith.constant dense<0.000000e+00> : vector<8x128xf32>
    %107 = tpu.matmul %106, %10, %cst_45 {dimension_numbers = #tpu.dot_dimension_numbers<[1], [0], [0], [1], [0, 0, 1, 1], [], []>} : vector<8x32xbf16>, vector<32x128xbf16>, vector<8x128xf32> -> vector<8x128xf32>
    %108 = arith.addf %105, %107 : vector<8x128xf32>
    %cst_46 = arith.constant 5.000000e-01 : f32
    %109 = vector.broadcast %cst_46 : f32 to vector<8x128xf32>
    %110 = arith.mulf %108, %109 : vector<8x128xf32>
    %111 = math.tanh %110 : vector<8x128xf32>
    %cst_47 = arith.constant 5.000000e-01 : f32
    %112 = vector.broadcast %cst_47 : f32 to vector<8x128xf32>
    %113 = arith.mulf %111, %112 : vector<8x128xf32>
    %cst_48 = arith.constant 5.000000e-01 : f32
    %114 = vector.broadcast %cst_48 : f32 to vector<8x128xf32>
    %115 = arith.addf %113, %114 : vector<8x128xf32>
    %116 = vector.extract_strided_slice %115 {offsets = [0, 0], sizes = [8, 32], strides = [1, 1]} : vector<8x128xf32> to vector<8x32xf32>
    %117 = vector.extract_strided_slice %115 {offsets = [0, 32], sizes = [8, 32], strides = [1, 1]} : vector<8x128xf32> to vector<8x32xf32>
    %118 = vector.extract_strided_slice %115 {offsets = [0, 64], sizes = [8, 32], strides = [1, 1]} : vector<8x128xf32> to vector<8x32xf32>
    %cst_49 = arith.constant 2.000000e+00 : f32
    %119 = vector.broadcast %cst_49 : f32 to vector<8x32xf32>
    %120 = arith.mulf %119, %118 : vector<8x32xf32>
    %cst_50 = arith.constant 1.000000e+00 : f32
    %121 = vector.broadcast %cst_50 : f32 to vector<8x32xf32>
    %122 = arith.subf %120, %121 : vector<8x32xf32>
    %123 = vector.extract_strided_slice %115 {offsets = [0, 96], sizes = [8, 32], strides = [1, 1]} : vector<8x128xf32> to vector<8x32xf32>
    %124 = arith.mulf %117, %96 : vector<8x32xf32>
    %125 = arith.mulf %116, %122 : vector<8x32xf32>
    %126 = arith.addf %124, %125 : vector<8x32xf32>
    %127 = math.tanh %126 : vector<8x32xf32>
    %128 = arith.mulf %123, %127 : vector<8x32xf32>
    %129 = arith.index_cast %c3_i32 : i32 to index
    %c0_51 = arith.constant 0 : index
    %c0_52 = arith.constant 0 : index
    %130 = vector.load %arg12[%129, %c0_51, %c0_52] : memref<8x8x32xf32, #tpu.memory_space<vmem>>, vector<1x8x32xf32>
    %131 = vector.shape_cast %130 : vector<1x8x32xf32> to vector<8x32xf32>
    %132 = vector.shape_cast %128 : vector<8x32xf32> to vector<1x8x32xf32>
    tpu.vector_store %arg12[%129, %c0_51, %c0_52], %132 {strides = array<i32>} : memref<8x8x32xf32, #tpu.memory_space<vmem>>, vector<1x8x32xf32>,
    %c4_i32 = arith.constant 4 : i32
    %133 = arith.index_cast %c4_i32 : i32 to index
    %c0_53 = arith.constant 0 : index
    %c0_54 = arith.constant 0 : index
    %134 = vector.load %arg11[%133, %c0_53, %c0_54] : memref<8x8x128xf32, #tpu.memory_space<vmem>>, vector<1x8x128xf32>
    %135 = vector.shape_cast %134 : vector<1x8x128xf32> to vector<8x128xf32>
    %136 = arith.truncf %128 : vector<8x32xf32> to vector<8x32xbf16>
    %cst_55 = arith.constant dense<0.000000e+00> : vector<8x128xf32>
    %137 = tpu.matmul %136, %10, %cst_55 {dimension_numbers = #tpu.dot_dimension_numbers<[1], [0], [0], [1], [0, 0, 1, 1], [], []>} : vector<8x32xbf16>, vector<32x128xbf16>, vector<8x128xf32> -> vector<8x128xf32>
    %138 = arith.addf %135, %137 : vector<8x128xf32>
    %cst_56 = arith.constant 5.000000e-01 : f32
    %139 = vector.broadcast %cst_56 : f32 to vector<8x128xf32>
    %140 = arith.mulf %138, %139 : vector<8x128xf32>
    %141 = math.tanh %140 : vector<8x128xf32>
    %cst_57 = arith.constant 5.000000e-01 : f32
    %142 = vector.broadcast %cst_57 : f32 to vector<8x128xf32>
    %143 = arith.mulf %141, %142 : vector<8x128xf32>
    %cst_58 = arith.constant 5.000000e-01 : f32
    %144 = vector.broadcast %cst_58 : f32 to vector<8x128xf32>
    %145 = arith.addf %143, %144 : vector<8x128xf32>
    %146 = vector.extract_strided_slice %145 {offsets = [0, 0], sizes = [8, 32], strides = [1, 1]} : vector<8x128xf32> to vector<8x32xf32>
    %147 = vector.extract_strided_slice %145 {offsets = [0, 32], sizes = [8, 32], strides = [1, 1]} : vector<8x128xf32> to vector<8x32xf32>
    %148 = vector.extract_strided_slice %145 {offsets = [0, 64], sizes = [8, 32], strides = [1, 1]} : vector<8x128xf32> to vector<8x32xf32>
    %cst_59 = arith.constant 2.000000e+00 : f32
    %149 = vector.broadcast %cst_59 : f32 to vector<8x32xf32>
    %150 = arith.mulf %149, %148 : vector<8x32xf32>
    %cst_60 = arith.constant 1.000000e+00 : f32
    %151 = vector.broadcast %cst_60 : f32 to vector<8x32xf32>
    %152 = arith.subf %150, %151 : vector<8x32xf32>
    %153 = vector.extract_strided_slice %145 {offsets = [0, 96], sizes = [8, 32], strides = [1, 1]} : vector<8x128xf32> to vector<8x32xf32>
    %154 = arith.mulf %147, %126 : vector<8x32xf32>
    %155 = arith.mulf %146, %152 : vector<8x32xf32>
    %156 = arith.addf %154, %155 : vector<8x32xf32>
    %157 = math.tanh %156 : vector<8x32xf32>
    %158 = arith.mulf %153, %157 : vector<8x32xf32>
    %159 = arith.index_cast %c4_i32 : i32 to index
    %c0_61 = arith.constant 0 : index
    %c0_62 = arith.constant 0 : index
    %160 = vector.load %arg12[%159, %c0_61, %c0_62] : memref<8x8x32xf32, #tpu.memory_space<vmem>>, vector<1x8x32xf32>
    %161 = vector.shape_cast %160 : vector<1x8x32xf32> to vector<8x32xf32>
    %162 = vector.shape_cast %158 : vector<8x32xf32> to vector<1x8x32xf32>
    tpu.vector_store %arg12[%159, %c0_61, %c0_62], %162 {strides = array<i32>} : memref<8x8x32xf32, #tpu.memory_space<vmem>>, vector<1x8x32xf32>,
    %c5_i32 = arith.constant 5 : i32
    %163 = arith.index_cast %c5_i32 : i32 to index
    %c0_63 = arith.constant 0 : index
    %c0_64 = arith.constant 0 : index
    %164 = vector.load %arg11[%163, %c0_63, %c0_64] : memref<8x8x128xf32, #tpu.memory_space<vmem>>, vector<1x8x128xf32>
    %165 = vector.shape_cast %164 : vector<1x8x128xf32> to vector<8x128xf32>
    %166 = arith.truncf %158 : vector<8x32xf32> to vector<8x32xbf16>
    %cst_65 = arith.constant dense<0.000000e+00> : vector<8x128xf32>
    %167 = tpu.matmul %166, %10, %cst_65 {dimension_numbers = #tpu.dot_dimension_numbers<[1], [0], [0], [1], [0, 0, 1, 1], [], []>} : vector<8x32xbf16>, vector<32x128xbf16>, vector<8x128xf32> -> vector<8x128xf32>
    %168 = arith.addf %165, %167 : vector<8x128xf32>
    %cst_66 = arith.constant 5.000000e-01 : f32
    %169 = vector.broadcast %cst_66 : f32 to vector<8x128xf32>
    %170 = arith.mulf %168, %169 : vector<8x128xf32>
    %171 = math.tanh %170 : vector<8x128xf32>
    %cst_67 = arith.constant 5.000000e-01 : f32
    %172 = vector.broadcast %cst_67 : f32 to vector<8x128xf32>
    %173 = arith.mulf %171, %172 : vector<8x128xf32>
    %cst_68 = arith.constant 5.000000e-01 : f32
    %174 = vector.broadcast %cst_68 : f32 to vector<8x128xf32>
    %175 = arith.addf %173, %174 : vector<8x128xf32>
    %176 = vector.extract_strided_slice %175 {offsets = [0, 0], sizes = [8, 32], strides = [1, 1]} : vector<8x128xf32> to vector<8x32xf32>
    %177 = vector.extract_strided_slice %175 {offsets = [0, 32], sizes = [8, 32], strides = [1, 1]} : vector<8x128xf32> to vector<8x32xf32>
    %178 = vector.extract_strided_slice %175 {offsets = [0, 64], sizes = [8, 32], strides = [1, 1]} : vector<8x128xf32> to vector<8x32xf32>
    %cst_69 = arith.constant 2.000000e+00 : f32
    %179 = vector.broadcast %cst_69 : f32 to vector<8x32xf32>
    %180 = arith.mulf %179, %178 : vector<8x32xf32>
    %cst_70 = arith.constant 1.000000e+00 : f32
    %181 = vector.broadcast %cst_70 : f32 to vector<8x32xf32>
    %182 = arith.subf %180, %181 : vector<8x32xf32>
    %183 = vector.extract_strided_slice %175 {offsets = [0, 96], sizes = [8, 32], strides = [1, 1]} : vector<8x128xf32> to vector<8x32xf32>
    %184 = arith.mulf %177, %156 : vector<8x32xf32>
    %185 = arith.mulf %176, %182 : vector<8x32xf32>
    %186 = arith.addf %184, %185 : vector<8x32xf32>
    %187 = math.tanh %186 : vector<8x32xf32>
    %188 = arith.mulf %183, %187 : vector<8x32xf32>
    %189 = arith.index_cast %c5_i32 : i32 to index
    %c0_71 = arith.constant 0 : index
    %c0_72 = arith.constant 0 : index
    %190 = vector.load %arg12[%189, %c0_71, %c0_72] : memref<8x8x32xf32, #tpu.memory_space<vmem>>, vector<1x8x32xf32>
    %191 = vector.shape_cast %190 : vector<1x8x32xf32> to vector<8x32xf32>
    %192 = vector.shape_cast %188 : vector<8x32xf32> to vector<1x8x32xf32>
    tpu.vector_store %arg12[%189, %c0_71, %c0_72], %192 {strides = array<i32>} : memref<8x8x32xf32, #tpu.memory_space<vmem>>, vector<1x8x32xf32>,
    %c6_i32 = arith.constant 6 : i32
    %193 = arith.index_cast %c6_i32 : i32 to index
    %c0_73 = arith.constant 0 : index
    %c0_74 = arith.constant 0 : index
    %194 = vector.load %arg11[%193, %c0_73, %c0_74] : memref<8x8x128xf32, #tpu.memory_space<vmem>>, vector<1x8x128xf32>
    %195 = vector.shape_cast %194 : vector<1x8x128xf32> to vector<8x128xf32>
    %196 = arith.truncf %188 : vector<8x32xf32> to vector<8x32xbf16>
    %cst_75 = arith.constant dense<0.000000e+00> : vector<8x128xf32>
    %197 = tpu.matmul %196, %10, %cst_75 {dimension_numbers = #tpu.dot_dimension_numbers<[1], [0], [0], [1], [0, 0, 1, 1], [], []>} : vector<8x32xbf16>, vector<32x128xbf16>, vector<8x128xf32> -> vector<8x128xf32>
    %198 = arith.addf %195, %197 : vector<8x128xf32>
    %cst_76 = arith.constant 5.000000e-01 : f32
    %199 = vector.broadcast %cst_76 : f32 to vector<8x128xf32>
    %200 = arith.mulf %198, %199 : vector<8x128xf32>
    %201 = math.tanh %200 : vector<8x128xf32>
    %cst_77 = arith.constant 5.000000e-01 : f32
    %202 = vector.broadcast %cst_77 : f32 to vector<8x128xf32>
    %203 = arith.mulf %201, %202 : vector<8x128xf32>
    %cst_78 = arith.constant 5.000000e-01 : f32
    %204 = vector.broadcast %cst_78 : f32 to vector<8x128xf32>
    %205 = arith.addf %203, %204 : vector<8x128xf32>
    %206 = vector.extract_strided_slice %205 {offsets = [0, 0], sizes = [8, 32], strides = [1, 1]} : vector<8x128xf32> to vector<8x32xf32>
    %207 = vector.extract_strided_slice %205 {offsets = [0, 32], sizes = [8, 32], strides = [1, 1]} : vector<8x128xf32> to vector<8x32xf32>
    %208 = vector.extract_strided_slice %205 {offsets = [0, 64], sizes = [8, 32], strides = [1, 1]} : vector<8x128xf32> to vector<8x32xf32>
    %cst_79 = arith.constant 2.000000e+00 : f32
    %209 = vector.broadcast %cst_79 : f32 to vector<8x32xf32>
    %210 = arith.mulf %209, %208 : vector<8x32xf32>
    %cst_80 = arith.constant 1.000000e+00 : f32
    %211 = vector.broadcast %cst_80 : f32 to vector<8x32xf32>
    %212 = arith.subf %210, %211 : vector<8x32xf32>
    %213 = vector.extract_strided_slice %205 {offsets = [0, 96], sizes = [8, 32], strides = [1, 1]} : vector<8x128xf32> to vector<8x32xf32>
    %214 = arith.mulf %207, %186 : vector<8x32xf32>
    %215 = arith.mulf %206, %212 : vector<8x32xf32>
    %216 = arith.addf %214, %215 : vector<8x32xf32>
    %217 = math.tanh %216 : vector<8x32xf32>
    %218 = arith.mulf %213, %217 : vector<8x32xf32>
    %219 = arith.index_cast %c6_i32 : i32 to index
    %c0_81 = arith.constant 0 : index
    %c0_82 = arith.constant 0 : index
    %220 = vector.load %arg12[%219, %c0_81, %c0_82] : memref<8x8x32xf32, #tpu.memory_space<vmem>>, vector<1x8x32xf32>
    %221 = vector.shape_cast %220 : vector<1x8x32xf32> to vector<8x32xf32>
    %222 = vector.shape_cast %218 : vector<8x32xf32> to vector<1x8x32xf32>
    tpu.vector_store %arg12[%219, %c0_81, %c0_82], %222 {strides = array<i32>} : memref<8x8x32xf32, #tpu.memory_space<vmem>>, vector<1x8x32xf32>,
    %c7_i32 = arith.constant 7 : i32
    %223 = arith.index_cast %c7_i32 : i32 to index
    %c0_83 = arith.constant 0 : index
    %c0_84 = arith.constant 0 : index
    %224 = vector.load %arg11[%223, %c0_83, %c0_84] : memref<8x8x128xf32, #tpu.memory_space<vmem>>, vector<1x8x128xf32>
    %225 = vector.shape_cast %224 : vector<1x8x128xf32> to vector<8x128xf32>
    %226 = arith.truncf %218 : vector<8x32xf32> to vector<8x32xbf16>
    %cst_85 = arith.constant dense<0.000000e+00> : vector<8x128xf32>
    %227 = tpu.matmul %226, %10, %cst_85 {dimension_numbers = #tpu.dot_dimension_numbers<[1], [0], [0], [1], [0, 0, 1, 1], [], []>} : vector<8x32xbf16>, vector<32x128xbf16>, vector<8x128xf32> -> vector<8x128xf32>
    %228 = arith.addf %225, %227 : vector<8x128xf32>
    %cst_86 = arith.constant 5.000000e-01 : f32
    %229 = vector.broadcast %cst_86 : f32 to vector<8x128xf32>
    %230 = arith.mulf %228, %229 : vector<8x128xf32>
    %231 = math.tanh %230 : vector<8x128xf32>
    %cst_87 = arith.constant 5.000000e-01 : f32
    %232 = vector.broadcast %cst_87 : f32 to vector<8x128xf32>
    %233 = arith.mulf %231, %232 : vector<8x128xf32>
    %cst_88 = arith.constant 5.000000e-01 : f32
    %234 = vector.broadcast %cst_88 : f32 to vector<8x128xf32>
    %235 = arith.addf %233, %234 : vector<8x128xf32>
    %236 = vector.extract_strided_slice %235 {offsets = [0, 0], sizes = [8, 32], strides = [1, 1]} : vector<8x128xf32> to vector<8x32xf32>
    %237 = vector.extract_strided_slice %235 {offsets = [0, 32], sizes = [8, 32], strides = [1, 1]} : vector<8x128xf32> to vector<8x32xf32>
    %238 = vector.extract_strided_slice %235 {offsets = [0, 64], sizes = [8, 32], strides = [1, 1]} : vector<8x128xf32> to vector<8x32xf32>
    %cst_89 = arith.constant 2.000000e+00 : f32
    %239 = vector.broadcast %cst_89 : f32 to vector<8x32xf32>
    %240 = arith.mulf %239, %238 : vector<8x32xf32>
    %cst_90 = arith.constant 1.000000e+00 : f32
    %241 = vector.broadcast %cst_90 : f32 to vector<8x32xf32>
    %242 = arith.subf %240, %241 : vector<8x32xf32>
    %243 = vector.extract_strided_slice %235 {offsets = [0, 96], sizes = [8, 32], strides = [1, 1]} : vector<8x128xf32> to vector<8x32xf32>
    %244 = arith.mulf %237, %216 : vector<8x32xf32>
    %245 = arith.mulf %236, %242 : vector<8x32xf32>
    %246 = arith.addf %244, %245 : vector<8x32xf32>
    %247 = math.tanh %246 : vector<8x32xf32>
    %248 = arith.mulf %243, %247 : vector<8x32xf32>
    %249 = arith.index_cast %c7_i32 : i32 to index
    %c0_91 = arith.constant 0 : index
    %c0_92 = arith.constant 0 : index
    %250 = vector.load %arg12[%249, %c0_91, %c0_92] : memref<8x8x32xf32, #tpu.memory_space<vmem>>, vector<1x8x32xf32>
    %251 = vector.shape_cast %250 : vector<1x8x32xf32> to vector<8x32xf32>
    %252 = vector.shape_cast %248 : vector<8x32xf32> to vector<1x8x32xf32>
    tpu.vector_store %arg12[%249, %c0_91, %c0_92], %252 {strides = array<i32>} : memref<8x8x32xf32, #tpu.memory_space<vmem>>, vector<1x8x32xf32>,
    %c8_i32 = arith.constant 8 : i32
    %c0_93 = arith.constant 0 : index
    %c0_94 = arith.constant 0 : index
    %c0_95 = arith.constant 0 : index
    %253 = vector.load %arg12[%c0_93, %c0_94, %c0_95] : memref<8x8x32xf32, #tpu.memory_space<vmem>>, vector<8x8x32xf32>
    %254 = arith.truncf %253 : vector<8x8x32xf32> to vector<8x8x32xbf16>
    %255 = vector.shape_cast %254 : vector<8x8x32xbf16> to vector<64x32xbf16>
    %c0_96 = arith.constant 0 : index
    %c0_97 = arith.constant 0 : index
    %256 = vector.load %arg5[%c0_96, %c0_97] : memref<32x128xbf16, #tpu.memory_space<vmem>>, vector<32x128xbf16>
    %cst_98 = arith.constant dense<0.000000e+00> : vector<64x128xf32>
    %257 = tpu.matmul %255, %256, %cst_98 {dimension_numbers = #tpu.dot_dimension_numbers<[1], [0], [0], [1], [0, 0, 1, 1], [], []>} : vector<64x32xbf16>, vector<32x128xbf16>, vector<64x128xf32> -> vector<64x128xf32>
    %c0_99 = arith.constant 0 : index
    %c0_100 = arith.constant 0 : index
    %258 = vector.load %arg7[%c0_99, %c0_100] : memref<1x128xf32, #tpu.memory_space<vmem>>, vector<1x128xf32>
    %259 = vector.broadcast %258 : vector<1x128xf32> to vector<64x128xf32>
    %260 = arith.addf %257, %259 : vector<64x128xf32>
    %261 = vector.shape_cast %260 : vector<64x128xf32> to vector<8x8x128xf32>
    %c0_101 = arith.constant 0 : index
    %c0_102 = arith.constant 0 : index
    %c0_103 = arith.constant 0 : index
    %262 = vector.load %arg11[%c0_101, %c0_102, %c0_103] : memref<8x8x128xf32, #tpu.memory_space<vmem>>, vector<8x8x128xf32>
    tpu.vector_store %arg11[%c0_101, %c0_102, %c0_103], %261 {strides = array<i32>} : memref<8x8x128xf32, #tpu.memory_space<vmem>>, vector<8x8x128xf32>,
    %c0_104 = arith.constant 0 : index
    %c0_105 = arith.constant 0 : index
    %263 = vector.load %arg6[%c0_104, %c0_105] : memref<32x128xbf16, #tpu.memory_space<vmem>>, vector<32x128xbf16>
    %cst_106 = arith.constant 0.000000e+00 : f32
    %264 = vector.broadcast %cst_106 : f32 to vector<8x32xf32>
    %cst_107 = arith.constant 0.000000e+00 : f32
    %265 = vector.broadcast %cst_107 : f32 to vector<8x32xf32>
    %c0_i32_108 = arith.constant 0 : i32
    %266 = arith.index_cast %c0_i32_108 : i32 to index
    %c0_109 = arith.constant 0 : index
    %c0_110 = arith.constant 0 : index
    %267 = vector.load %arg11[%266, %c0_109, %c0_110] : memref<8x8x128xf32, #tpu.memory_space<vmem>>, vector<1x8x128xf32>
    %268 = vector.shape_cast %267 : vector<1x8x128xf32> to vector<8x128xf32>
    %269 = arith.truncf %264 : vector<8x32xf32> to vector<8x32xbf16>
    %cst_111 = arith.constant dense<0.000000e+00> : vector<8x128xf32>
    %270 = tpu.matmul %269, %263, %cst_111 {dimension_numbers = #tpu.dot_dimension_numbers<[1], [0], [0], [1], [0, 0, 1, 1], [], []>} : vector<8x32xbf16>, vector<32x128xbf16>, vector<8x128xf32> -> vector<8x128xf32>
    %271 = arith.addf %268, %270 : vector<8x128xf32>
    %cst_112 = arith.constant 5.000000e-01 : f32
    %272 = vector.broadcast %cst_112 : f32 to vector<8x128xf32>
    %273 = arith.mulf %271, %272 : vector<8x128xf32>
    %274 = math.tanh %273 : vector<8x128xf32>
    %cst_113 = arith.constant 5.000000e-01 : f32
    %275 = vector.broadcast %cst_113 : f32 to vector<8x128xf32>
    %276 = arith.mulf %274, %275 : vector<8x128xf32>
    %cst_114 = arith.constant 5.000000e-01 : f32
    %277 = vector.broadcast %cst_114 : f32 to vector<8x128xf32>
    %278 = arith.addf %276, %277 : vector<8x128xf32>
    %279 = vector.extract_strided_slice %278 {offsets = [0, 0], sizes = [8, 32], strides = [1, 1]} : vector<8x128xf32> to vector<8x32xf32>
    %280 = vector.extract_strided_slice %278 {offsets = [0, 32], sizes = [8, 32], strides = [1, 1]} : vector<8x128xf32> to vector<8x32xf32>
    %281 = vector.extract_strided_slice %278 {offsets = [0, 64], sizes = [8, 32], strides = [1, 1]} : vector<8x128xf32> to vector<8x32xf32>
    %cst_115 = arith.constant 2.000000e+00 : f32
    %282 = vector.broadcast %cst_115 : f32 to vector<8x32xf32>
    %283 = arith.mulf %282, %281 : vector<8x32xf32>
    %cst_116 = arith.constant 1.000000e+00 : f32
    %284 = vector.broadcast %cst_116 : f32 to vector<8x32xf32>
    %285 = arith.subf %283, %284 : vector<8x32xf32>
    %286 = vector.extract_strided_slice %278 {offsets = [0, 96], sizes = [8, 32], strides = [1, 1]} : vector<8x128xf32> to vector<8x32xf32>
    %287 = arith.mulf %280, %265 : vector<8x32xf32>
    %288 = arith.mulf %279, %285 : vector<8x32xf32>
    %289 = arith.addf %287, %288 : vector<8x32xf32>
    %290 = math.tanh %289 : vector<8x32xf32>
    %291 = arith.mulf %286, %290 : vector<8x32xf32>
    %c1_i32_117 = arith.constant 1 : i32
    %292 = arith.index_cast %c1_i32_117 : i32 to index
    %c0_118 = arith.constant 0 : index
    %c0_119 = arith.constant 0 : index
    %293 = vector.load %arg11[%292, %c0_118, %c0_119] : memref<8x8x128xf32, #tpu.memory_space<vmem>>, vector<1x8x128xf32>
    %294 = vector.shape_cast %293 : vector<1x8x128xf32> to vector<8x128xf32>
    %295 = arith.truncf %291 : vector<8x32xf32> to vector<8x32xbf16>
    %cst_120 = arith.constant dense<0.000000e+00> : vector<8x128xf32>
    %296 = tpu.matmul %295, %263, %cst_120 {dimension_numbers = #tpu.dot_dimension_numbers<[1], [0], [0], [1], [0, 0, 1, 1], [], []>} : vector<8x32xbf16>, vector<32x128xbf16>, vector<8x128xf32> -> vector<8x128xf32>
    %297 = arith.addf %294, %296 : vector<8x128xf32>
    %cst_121 = arith.constant 5.000000e-01 : f32
    %298 = vector.broadcast %cst_121 : f32 to vector<8x128xf32>
    %299 = arith.mulf %297, %298 : vector<8x128xf32>
    %300 = math.tanh %299 : vector<8x128xf32>
    %cst_122 = arith.constant 5.000000e-01 : f32
    %301 = vector.broadcast %cst_122 : f32 to vector<8x128xf32>
    %302 = arith.mulf %300, %301 : vector<8x128xf32>
    %cst_123 = arith.constant 5.000000e-01 : f32
    %303 = vector.broadcast %cst_123 : f32 to vector<8x128xf32>
    %304 = arith.addf %302, %303 : vector<8x128xf32>
    %305 = vector.extract_strided_slice %304 {offsets = [0, 0], sizes = [8, 32], strides = [1, 1]} : vector<8x128xf32> to vector<8x32xf32>
    %306 = vector.extract_strided_slice %304 {offsets = [0, 32], sizes = [8, 32], strides = [1, 1]} : vector<8x128xf32> to vector<8x32xf32>
    %307 = vector.extract_strided_slice %304 {offsets = [0, 64], sizes = [8, 32], strides = [1, 1]} : vector<8x128xf32> to vector<8x32xf32>
    %cst_124 = arith.constant 2.000000e+00 : f32
    %308 = vector.broadcast %cst_124 : f32 to vector<8x32xf32>
    %309 = arith.mulf %308, %307 : vector<8x32xf32>
    %cst_125 = arith.constant 1.000000e+00 : f32
    %310 = vector.broadcast %cst_125 : f32 to vector<8x32xf32>
    %311 = arith.subf %309, %310 : vector<8x32xf32>
    %312 = vector.extract_strided_slice %304 {offsets = [0, 96], sizes = [8, 32], strides = [1, 1]} : vector<8x128xf32> to vector<8x32xf32>
    %313 = arith.mulf %306, %289 : vector<8x32xf32>
    %314 = arith.mulf %305, %311 : vector<8x32xf32>
    %315 = arith.addf %313, %314 : vector<8x32xf32>
    %316 = math.tanh %315 : vector<8x32xf32>
    %317 = arith.mulf %312, %316 : vector<8x32xf32>
    %c2_i32_126 = arith.constant 2 : i32
    %318 = arith.index_cast %c2_i32_126 : i32 to index
    %c0_127 = arith.constant 0 : index
    %c0_128 = arith.constant 0 : index
    %319 = vector.load %arg11[%318, %c0_127, %c0_128] : memref<8x8x128xf32, #tpu.memory_space<vmem>>, vector<1x8x128xf32>
    %320 = vector.shape_cast %319 : vector<1x8x128xf32> to vector<8x128xf32>
    %321 = arith.truncf %317 : vector<8x32xf32> to vector<8x32xbf16>
    %cst_129 = arith.constant dense<0.000000e+00> : vector<8x128xf32>
    %322 = tpu.matmul %321, %263, %cst_129 {dimension_numbers = #tpu.dot_dimension_numbers<[1], [0], [0], [1], [0, 0, 1, 1], [], []>} : vector<8x32xbf16>, vector<32x128xbf16>, vector<8x128xf32> -> vector<8x128xf32>
    %323 = arith.addf %320, %322 : vector<8x128xf32>
    %cst_130 = arith.constant 5.000000e-01 : f32
    %324 = vector.broadcast %cst_130 : f32 to vector<8x128xf32>
    %325 = arith.mulf %323, %324 : vector<8x128xf32>
    %326 = math.tanh %325 : vector<8x128xf32>
    %cst_131 = arith.constant 5.000000e-01 : f32
    %327 = vector.broadcast %cst_131 : f32 to vector<8x128xf32>
    %328 = arith.mulf %326, %327 : vector<8x128xf32>
    %cst_132 = arith.constant 5.000000e-01 : f32
    %329 = vector.broadcast %cst_132 : f32 to vector<8x128xf32>
    %330 = arith.addf %328, %329 : vector<8x128xf32>
    %331 = vector.extract_strided_slice %330 {offsets = [0, 0], sizes = [8, 32], strides = [1, 1]} : vector<8x128xf32> to vector<8x32xf32>
    %332 = vector.extract_strided_slice %330 {offsets = [0, 32], sizes = [8, 32], strides = [1, 1]} : vector<8x128xf32> to vector<8x32xf32>
    %333 = vector.extract_strided_slice %330 {offsets = [0, 64], sizes = [8, 32], strides = [1, 1]} : vector<8x128xf32> to vector<8x32xf32>
    %cst_133 = arith.constant 2.000000e+00 : f32
    %334 = vector.broadcast %cst_133 : f32 to vector<8x32xf32>
    %335 = arith.mulf %334, %333 : vector<8x32xf32>
    %cst_134 = arith.constant 1.000000e+00 : f32
    %336 = vector.broadcast %cst_134 : f32 to vector<8x32xf32>
    %337 = arith.subf %335, %336 : vector<8x32xf32>
    %338 = vector.extract_strided_slice %330 {offsets = [0, 96], sizes = [8, 32], strides = [1, 1]} : vector<8x128xf32> to vector<8x32xf32>
    %339 = arith.mulf %332, %315 : vector<8x32xf32>
    %340 = arith.mulf %331, %337 : vector<8x32xf32>
    %341 = arith.addf %339, %340 : vector<8x32xf32>
    %342 = math.tanh %341 : vector<8x32xf32>
    %343 = arith.mulf %338, %342 : vector<8x32xf32>
    %c3_i32_135 = arith.constant 3 : i32
    %344 = arith.index_cast %c3_i32_135 : i32 to index
    %c0_136 = arith.constant 0 : index
    %c0_137 = arith.constant 0 : index
    %345 = vector.load %arg11[%344, %c0_136, %c0_137] : memref<8x8x128xf32, #tpu.memory_space<vmem>>, vector<1x8x128xf32>
    %346 = vector.shape_cast %345 : vector<1x8x128xf32> to vector<8x128xf32>
    %347 = arith.truncf %343 : vector<8x32xf32> to vector<8x32xbf16>
    %cst_138 = arith.constant dense<0.000000e+00> : vector<8x128xf32>
    %348 = tpu.matmul %347, %263, %cst_138 {dimension_numbers = #tpu.dot_dimension_numbers<[1], [0], [0], [1], [0, 0, 1, 1], [], []>} : vector<8x32xbf16>, vector<32x128xbf16>, vector<8x128xf32> -> vector<8x128xf32>
    %349 = arith.addf %346, %348 : vector<8x128xf32>
    %cst_139 = arith.constant 5.000000e-01 : f32
    %350 = vector.broadcast %cst_139 : f32 to vector<8x128xf32>
    %351 = arith.mulf %349, %350 : vector<8x128xf32>
    %352 = math.tanh %351 : vector<8x128xf32>
    %cst_140 = arith.constant 5.000000e-01 : f32
    %353 = vector.broadcast %cst_140 : f32 to vector<8x128xf32>
    %354 = arith.mulf %352, %353 : vector<8x128xf32>
    %cst_141 = arith.constant 5.000000e-01 : f32
    %355 = vector.broadcast %cst_141 : f32 to vector<8x128xf32>
    %356 = arith.addf %354, %355 : vector<8x128xf32>
    %357 = vector.extract_strided_slice %356 {offsets = [0, 0], sizes = [8, 32], strides = [1, 1]} : vector<8x128xf32> to vector<8x32xf32>
    %358 = vector.extract_strided_slice %356 {offsets = [0, 32], sizes = [8, 32], strides = [1, 1]} : vector<8x128xf32> to vector<8x32xf32>
    %359 = vector.extract_strided_slice %356 {offsets = [0, 64], sizes = [8, 32], strides = [1, 1]} : vector<8x128xf32> to vector<8x32xf32>
    %cst_142 = arith.constant 2.000000e+00 : f32
    %360 = vector.broadcast %cst_142 : f32 to vector<8x32xf32>
    %361 = arith.mulf %360, %359 : vector<8x32xf32>
    %cst_143 = arith.constant 1.000000e+00 : f32
    %362 = vector.broadcast %cst_143 : f32 to vector<8x32xf32>
    %363 = arith.subf %361, %362 : vector<8x32xf32>
    %364 = vector.extract_strided_slice %356 {offsets = [0, 96], sizes = [8, 32], strides = [1, 1]} : vector<8x128xf32> to vector<8x32xf32>
    %365 = arith.mulf %358, %341 : vector<8x32xf32>
    %366 = arith.mulf %357, %363 : vector<8x32xf32>
    %367 = arith.addf %365, %366 : vector<8x32xf32>
    %368 = math.tanh %367 : vector<8x32xf32>
    %369 = arith.mulf %364, %368 : vector<8x32xf32>
    %c4_i32_144 = arith.constant 4 : i32
    %370 = arith.index_cast %c4_i32_144 : i32 to index
    %c0_145 = arith.constant 0 : index
    %c0_146 = arith.constant 0 : index
    %371 = vector.load %arg11[%370, %c0_145, %c0_146] : memref<8x8x128xf32, #tpu.memory_space<vmem>>, vector<1x8x128xf32>
    %372 = vector.shape_cast %371 : vector<1x8x128xf32> to vector<8x128xf32>
    %373 = arith.truncf %369 : vector<8x32xf32> to vector<8x32xbf16>
    %cst_147 = arith.constant dense<0.000000e+00> : vector<8x128xf32>
    %374 = tpu.matmul %373, %263, %cst_147 {dimension_numbers = #tpu.dot_dimension_numbers<[1], [0], [0], [1], [0, 0, 1, 1], [], []>} : vector<8x32xbf16>, vector<32x128xbf16>, vector<8x128xf32> -> vector<8x128xf32>
    %375 = arith.addf %372, %374 : vector<8x128xf32>
    %cst_148 = arith.constant 5.000000e-01 : f32
    %376 = vector.broadcast %cst_148 : f32 to vector<8x128xf32>
    %377 = arith.mulf %375, %376 : vector<8x128xf32>
    %378 = math.tanh %377 : vector<8x128xf32>
    %cst_149 = arith.constant 5.000000e-01 : f32
    %379 = vector.broadcast %cst_149 : f32 to vector<8x128xf32>
    %380 = arith.mulf %378, %379 : vector<8x128xf32>
    %cst_150 = arith.constant 5.000000e-01 : f32
    %381 = vector.broadcast %cst_150 : f32 to vector<8x128xf32>
    %382 = arith.addf %380, %381 : vector<8x128xf32>
    %383 = vector.extract_strided_slice %382 {offsets = [0, 0], sizes = [8, 32], strides = [1, 1]} : vector<8x128xf32> to vector<8x32xf32>
    %384 = vector.extract_strided_slice %382 {offsets = [0, 32], sizes = [8, 32], strides = [1, 1]} : vector<8x128xf32> to vector<8x32xf32>
    %385 = vector.extract_strided_slice %382 {offsets = [0, 64], sizes = [8, 32], strides = [1, 1]} : vector<8x128xf32> to vector<8x32xf32>
    %cst_151 = arith.constant 2.000000e+00 : f32
    %386 = vector.broadcast %cst_151 : f32 to vector<8x32xf32>
    %387 = arith.mulf %386, %385 : vector<8x32xf32>
    %cst_152 = arith.constant 1.000000e+00 : f32
    %388 = vector.broadcast %cst_152 : f32 to vector<8x32xf32>
    %389 = arith.subf %387, %388 : vector<8x32xf32>
    %390 = vector.extract_strided_slice %382 {offsets = [0, 96], sizes = [8, 32], strides = [1, 1]} : vector<8x128xf32> to vector<8x32xf32>
    %391 = arith.mulf %384, %367 : vector<8x32xf32>
    %392 = arith.mulf %383, %389 : vector<8x32xf32>
    %393 = arith.addf %391, %392 : vector<8x32xf32>
    %394 = math.tanh %393 : vector<8x32xf32>
    %395 = arith.mulf %390, %394 : vector<8x32xf32>
    %c5_i32_153 = arith.constant 5 : i32
    %396 = arith.index_cast %c5_i32_153 : i32 to index
    %c0_154 = arith.constant 0 : index
    %c0_155 = arith.constant 0 : index
    %397 = vector.load %arg11[%396, %c0_154, %c0_155] : memref<8x8x128xf32, #tpu.memory_space<vmem>>, vector<1x8x128xf32>
    %398 = vector.shape_cast %397 : vector<1x8x128xf32> to vector<8x128xf32>
    %399 = arith.truncf %395 : vector<8x32xf32> to vector<8x32xbf16>
    %cst_156 = arith.constant dense<0.000000e+00> : vector<8x128xf32>
    %400 = tpu.matmul %399, %263, %cst_156 {dimension_numbers = #tpu.dot_dimension_numbers<[1], [0], [0], [1], [0, 0, 1, 1], [], []>} : vector<8x32xbf16>, vector<32x128xbf16>, vector<8x128xf32> -> vector<8x128xf32>
    %401 = arith.addf %398, %400 : vector<8x128xf32>
    %cst_157 = arith.constant 5.000000e-01 : f32
    %402 = vector.broadcast %cst_157 : f32 to vector<8x128xf32>
    %403 = arith.mulf %401, %402 : vector<8x128xf32>
    %404 = math.tanh %403 : vector<8x128xf32>
    %cst_158 = arith.constant 5.000000e-01 : f32
    %405 = vector.broadcast %cst_158 : f32 to vector<8x128xf32>
    %406 = arith.mulf %404, %405 : vector<8x128xf32>
    %cst_159 = arith.constant 5.000000e-01 : f32
    %407 = vector.broadcast %cst_159 : f32 to vector<8x128xf32>
    %408 = arith.addf %406, %407 : vector<8x128xf32>
    %409 = vector.extract_strided_slice %408 {offsets = [0, 0], sizes = [8, 32], strides = [1, 1]} : vector<8x128xf32> to vector<8x32xf32>
    %410 = vector.extract_strided_slice %408 {offsets = [0, 32], sizes = [8, 32], strides = [1, 1]} : vector<8x128xf32> to vector<8x32xf32>
    %411 = vector.extract_strided_slice %408 {offsets = [0, 64], sizes = [8, 32], strides = [1, 1]} : vector<8x128xf32> to vector<8x32xf32>
    %cst_160 = arith.constant 2.000000e+00 : f32
    %412 = vector.broadcast %cst_160 : f32 to vector<8x32xf32>
    %413 = arith.mulf %412, %411 : vector<8x32xf32>
    %cst_161 = arith.constant 1.000000e+00 : f32
    %414 = vector.broadcast %cst_161 : f32 to vector<8x32xf32>
    %415 = arith.subf %413, %414 : vector<8x32xf32>
    %416 = vector.extract_strided_slice %408 {offsets = [0, 96], sizes = [8, 32], strides = [1, 1]} : vector<8x128xf32> to vector<8x32xf32>
    %417 = arith.mulf %410, %393 : vector<8x32xf32>
    %418 = arith.mulf %409, %415 : vector<8x32xf32>
    %419 = arith.addf %417, %418 : vector<8x32xf32>
    %420 = math.tanh %419 : vector<8x32xf32>
    %421 = arith.mulf %416, %420 : vector<8x32xf32>
    %c6_i32_162 = arith.constant 6 : i32
    %422 = arith.index_cast %c6_i32_162 : i32 to index
    %c0_163 = arith.constant 0 : index
    %c0_164 = arith.constant 0 : index
    %423 = vector.load %arg11[%422, %c0_163, %c0_164] : memref<8x8x128xf32, #tpu.memory_space<vmem>>, vector<1x8x128xf32>
    %424 = vector.shape_cast %423 : vector<1x8x128xf32> to vector<8x128xf32>
    %425 = arith.truncf %421 : vector<8x32xf32> to vector<8x32xbf16>
    %cst_165 = arith.constant dense<0.000000e+00> : vector<8x128xf32>
    %426 = tpu.matmul %425, %263, %cst_165 {dimension_numbers = #tpu.dot_dimension_numbers<[1], [0], [0], [1], [0, 0, 1, 1], [], []>} : vector<8x32xbf16>, vector<32x128xbf16>, vector<8x128xf32> -> vector<8x128xf32>
    %427 = arith.addf %424, %426 : vector<8x128xf32>
    %cst_166 = arith.constant 5.000000e-01 : f32
    %428 = vector.broadcast %cst_166 : f32 to vector<8x128xf32>
    %429 = arith.mulf %427, %428 : vector<8x128xf32>
    %430 = math.tanh %429 : vector<8x128xf32>
    %cst_167 = arith.constant 5.000000e-01 : f32
    %431 = vector.broadcast %cst_167 : f32 to vector<8x128xf32>
    %432 = arith.mulf %430, %431 : vector<8x128xf32>
    %cst_168 = arith.constant 5.000000e-01 : f32
    %433 = vector.broadcast %cst_168 : f32 to vector<8x128xf32>
    %434 = arith.addf %432, %433 : vector<8x128xf32>
    %435 = vector.extract_strided_slice %434 {offsets = [0, 0], sizes = [8, 32], strides = [1, 1]} : vector<8x128xf32> to vector<8x32xf32>
    %436 = vector.extract_strided_slice %434 {offsets = [0, 32], sizes = [8, 32], strides = [1, 1]} : vector<8x128xf32> to vector<8x32xf32>
    %437 = vector.extract_strided_slice %434 {offsets = [0, 64], sizes = [8, 32], strides = [1, 1]} : vector<8x128xf32> to vector<8x32xf32>
    %cst_169 = arith.constant 2.000000e+00 : f32
    %438 = vector.broadcast %cst_169 : f32 to vector<8x32xf32>
    %439 = arith.mulf %438, %437 : vector<8x32xf32>
    %cst_170 = arith.constant 1.000000e+00 : f32
    %440 = vector.broadcast %cst_170 : f32 to vector<8x32xf32>
    %441 = arith.subf %439, %440 : vector<8x32xf32>
    %442 = vector.extract_strided_slice %434 {offsets = [0, 96], sizes = [8, 32], strides = [1, 1]} : vector<8x128xf32> to vector<8x32xf32>
    %443 = arith.mulf %436, %419 : vector<8x32xf32>
    %444 = arith.mulf %435, %441 : vector<8x32xf32>
    %445 = arith.addf %443, %444 : vector<8x32xf32>
    %446 = math.tanh %445 : vector<8x32xf32>
    %447 = arith.mulf %442, %446 : vector<8x32xf32>
    %c7_i32_171 = arith.constant 7 : i32
    %448 = arith.index_cast %c7_i32_171 : i32 to index
    %c0_172 = arith.constant 0 : index
    %c0_173 = arith.constant 0 : index
    %449 = vector.load %arg11[%448, %c0_172, %c0_173] : memref<8x8x128xf32, #tpu.memory_space<vmem>>, vector<1x8x128xf32>
    %450 = vector.shape_cast %449 : vector<1x8x128xf32> to vector<8x128xf32>
    %451 = arith.truncf %447 : vector<8x32xf32> to vector<8x32xbf16>
    %cst_174 = arith.constant dense<0.000000e+00> : vector<8x128xf32>
    %452 = tpu.matmul %451, %263, %cst_174 {dimension_numbers = #tpu.dot_dimension_numbers<[1], [0], [0], [1], [0, 0, 1, 1], [], []>} : vector<8x32xbf16>, vector<32x128xbf16>, vector<8x128xf32> -> vector<8x128xf32>
    %453 = arith.addf %450, %452 : vector<8x128xf32>
    %cst_175 = arith.constant 5.000000e-01 : f32
    %454 = vector.broadcast %cst_175 : f32 to vector<8x128xf32>
    %455 = arith.mulf %453, %454 : vector<8x128xf32>
    %456 = math.tanh %455 : vector<8x128xf32>
    %cst_176 = arith.constant 5.000000e-01 : f32
    %457 = vector.broadcast %cst_176 : f32 to vector<8x128xf32>
    %458 = arith.mulf %456, %457 : vector<8x128xf32>
    %cst_177 = arith.constant 5.000000e-01 : f32
    %459 = vector.broadcast %cst_177 : f32 to vector<8x128xf32>
    %460 = arith.addf %458, %459 : vector<8x128xf32>
    %461 = vector.extract_strided_slice %460 {offsets = [0, 0], sizes = [8, 32], strides = [1, 1]} : vector<8x128xf32> to vector<8x32xf32>
    %462 = vector.extract_strided_slice %460 {offsets = [0, 32], sizes = [8, 32], strides = [1, 1]} : vector<8x128xf32> to vector<8x32xf32>
    %463 = vector.extract_strided_slice %460 {offsets = [0, 64], sizes = [8, 32], strides = [1, 1]} : vector<8x128xf32> to vector<8x32xf32>
    %cst_178 = arith.constant 2.000000e+00 : f32
    %464 = vector.broadcast %cst_178 : f32 to vector<8x32xf32>
    %465 = arith.mulf %464, %463 : vector<8x32xf32>
    %cst_179 = arith.constant 1.000000e+00 : f32
    %466 = vector.broadcast %cst_179 : f32 to vector<8x32xf32>
    %467 = arith.subf %465, %466 : vector<8x32xf32>
    %468 = vector.extract_strided_slice %460 {offsets = [0, 96], sizes = [8, 32], strides = [1, 1]} : vector<8x128xf32> to vector<8x32xf32>
    %469 = arith.mulf %462, %445 : vector<8x32xf32>
    %470 = arith.mulf %461, %467 : vector<8x32xf32>
    %471 = arith.addf %469, %470 : vector<8x32xf32>
    %472 = math.tanh %471 : vector<8x32xf32>
    %473 = arith.mulf %468, %472 : vector<8x32xf32>
    %c8_i32_180 = arith.constant 8 : i32
    %474 = arith.truncf %473 : vector<8x32xf32> to vector<8x32xbf16>
    %c0_181 = arith.constant 0 : index
    %c0_182 = arith.constant 0 : index
    %475 = vector.load %arg8[%c0_181, %c0_182] : memref<32x128xbf16, #tpu.memory_space<vmem>>, vector<32x128xbf16>
    %cst_183 = arith.constant dense<0.000000e+00> : vector<8x128xf32>
    %476 = tpu.matmul %474, %475, %cst_183 {dimension_numbers = #tpu.dot_dimension_numbers<[1], [0], [0], [1], [0, 0, 1, 1], [], []>} : vector<8x32xbf16>, vector<32x128xbf16>, vector<8x128xf32> -> vector<8x128xf32>
    %c0_184 = arith.constant 0 : index
    %c0_185 = arith.constant 0 : index
    %477 = vector.load %arg9[%c0_184, %c0_185] : memref<1x128xf32, #tpu.memory_space<vmem>>, vector<1x128xf32>
    %478 = vector.broadcast %477 : vector<1x128xf32> to vector<8x128xf32>
    %479 = arith.addf %476, %478 : vector<8x128xf32>
    %c0_186 = arith.constant 0 : index
    %c0_187 = arith.constant 0 : index
    %480 = vector.load %arg10[%c0_186, %c0_187] : memref<8x128xf32, #tpu.memory_space<vmem>>, vector<8x128xf32>
    tpu.vector_store %arg10[%c0_186, %c0_187], %479 {strides = array<i32>} : memref<8x128xf32, #tpu.memory_space<vmem>>, vector<8x128xf32>,
    return
  }
  func.func @transform_0(%arg0: i32) -> (i32, i32, i32) {
    %c0_i32 = arith.constant 0 : i32
    %c0_i32_0 = arith.constant 0 : i32
    %c0_i32_1 = arith.constant 0 : i32
    return %c0_i32, %arg0, %c0_i32_0 : i32, i32, i32
  }
  func.func @transform_1(%arg0: i32) -> (i32, i32) {
    %c0_i32 = arith.constant 0 : i32
    %c0_i32_0 = arith.constant 0 : i32
    %c0_i32_1 = arith.constant 0 : i32
    return %c0_i32, %c0_i32_0 : i32, i32
  }
  func.func @transform_2(%arg0: i32) -> (i32, i32) {
    %c0_i32 = arith.constant 0 : i32
    %c0_i32_0 = arith.constant 0 : i32
    %c0_i32_1 = arith.constant 0 : i32
    return %c0_i32, %c0_i32_0 : i32, i32
  }
  func.func @transform_3(%arg0: i32) -> (i32, i32) {
    %c0_i32 = arith.constant 0 : i32
    %c0_i32_0 = arith.constant 0 : i32
    %c0_i32_1 = arith.constant 0 : i32
    return %c0_i32, %c0_i32_0 : i32, i32
  }
  func.func @transform_4(%arg0: i32) -> (i32, i32) {
    %c0_i32 = arith.constant 0 : i32
    %c0_i32_0 = arith.constant 0 : i32
    %c0_i32_1 = arith.constant 0 : i32
    return %c0_i32, %c0_i32_0 : i32, i32
  }
  func.func @transform_5(%arg0: i32) -> (i32, i32) {
    %c0_i32 = arith.constant 0 : i32
    %c0_i32_0 = arith.constant 0 : i32
    %c0_i32_1 = arith.constant 0 : i32
    return %c0_i32, %c0_i32_0 : i32, i32
  }
  func.func @transform_6(%arg0: i32) -> (i32, i32) {
    %c0_i32 = arith.constant 0 : i32
    %c0_i32_0 = arith.constant 0 : i32
    %c0_i32_1 = arith.constant 0 : i32
    return %c0_i32, %c0_i32_0 : i32, i32
  }
  func.func @transform_7(%arg0: i32) -> (i32, i32) {
    %c0_i32 = arith.constant 0 : i32
    %c0_i32_0 = arith.constant 0 : i32
    %c0_i32_1 = arith.constant 0 : i32
    return %c0_i32, %c0_i32_0 : i32, i32
  }
  func.func @transform_8(%arg0: i32) -> (i32, i32) {
    %c0_i32 = arith.constant 0 : i32
    %c0_i32_0 = arith.constant 0 : i32
    %c0_i32_1 = arith.constant 0 : i32
    return %c0_i32, %c0_i32_0 : i32, i32
  }
  func.func @transform_9(%arg0: i32) -> (i32, i32) {
    %c0_i32 = arith.constant 0 : i32
    %c0_i32_0 = arith.constant 0 : i32
    return %arg0, %c0_i32 : i32, i32
  }
}

</mosaic_0001>

<bundles_post_ra>
// kernel: combined_lstm_forward.1
= control target key start
LH: loop header
LB: loop body
LE: loop exit
PB: predicated region body
PF: predicated region fallthrough
CT: control target
= control target key end

     0   :  { %s2590_s30 = smov 0   ;;  %s2592_s10 = smov 0   ;;  %s3011_s0 = inlined_call_operand.vmem [shape: f32[8,16,128], index: 0, kind: input, shape index: {}]   ;;  %s3012_s1 = inlined_call_operand.vmem [shape: bf16[128,128], index: 1, kind: input, shape index: {}]   ;;  %s3013_s2 = inlined_call_operand.vmem [shape: bf16[32,128], index: 2, kind: input, shape index: {}]   ;;  %s3014_s3 = inlined_call_operand.vmem [shape: f32[1,128], index: 3, kind: input, shape index: {}]   ;;  %s3015_s4 = inlined_call_operand.vmem [shape: bf16[32,128], index: 4, kind: input, shape index: {}]   ;;  %s3016_s5 = inlined_call_operand.vmem [shape: bf16[32,128], index: 5, kind: input, shape index: {}]   ;;  %s3017_s6 = inlined_call_operand.vmem [shape: f32[1,128], index: 6, kind: input, shape index: {}]   ;;  %s3018_s7 = inlined_call_operand.vmem [shape: bf16[32,128], index: 7, kind: input, shape index: {}]   ;;  %s3019_s8 = inlined_call_operand.vmem [shape: f32[1,128], index: 8, kind: input, shape index: {}]   ;;  %s3020_s9 = inlined_call_operand.vmem [shape: f32[16,128], index: 9, kind: output, shape index: {}]  }
   0x1   :  { %s2594_s11 = smov 0  }
   0x2 LB: > { %s2080_s12 = sadd.s32 4294967295, %s2533_s11   ;;  %s2607_s13 = sadd.s32 1, %s2533_s11   ;;  %s2533_s11 = sphi %s2594_s11, %s3023_s11   ;;  %s2529_s10 = sphi %s2592_s10, %s3022_s10   ;;  %s2525_s30 = sphi %s2590_s30, %s3021_s30  }
   0x3   : > { %s23_s14 = ssub.s32 %s2533_s11, %s2607_s13  ;;  %s26_s15 = sadd.s32 1, %s2529_s10 }
   0x4   : > { %p24_p0 = scmp.eq.s32.totalorder %s23_s14, 0  ;;  %p33_p1 = scmp.ne.s32.totalorder %s2529_s10, %s2525_s30 }
   0x5   : > { %p34_p2 = scmp.eq.s32.totalorder %s2533_s11, 0  ;;  %p2083_p4 = scmp.ge.s32.totalorder %s2533_s11, 2 }
   0x6   : > { %s2616_s16 = scalar_select %p24_p0, %s2529_s10, %s26_s15  }
   0x7   : > { %p35_p3 = por %p34_p2, %p33_p1  ;;  %277 = sbr.rel (%p2083_p4) target bundleno = 22 (0x16), region = 48 }
   0xe   : > { %280 = sbr.rel (!%p35_p3) target bundleno = 22 (0x16), region = 52  ;;  %s282_s17 = sand.u32 (%p35_p3), 1, %s2529_s10  }
   0xf   : > { %s2085_s18 = sshll.u32 (%p35_p3), %s2533_s11, 3  ;;  %s2084_s19 = sshll.u32 (%p35_p3), %s282_s17, 6 }
  0x10   : > { %s286_s22 = scalar_lea.vmem (%p35_p3), %s3011_s0, %s2085_s18  ;;  %s284_s23 = scalar_lea.vmem (%p35_p3), [#allocation5], %s2084_s19 }
  0x11   : > { %v328_v0 = vld [vmem:[%s286_s22] sm:$0xff] (%p35_p3)  ;;  %v330_v1 = vld [vmem:[%s286_s22 + $0x10] sm:$0xff] (%p35_p3) }
  0x12   : > { %v332_v2 = vld [vmem:[%s286_s22 + $0x20] sm:$0xff] (%p35_p3)  ;;  %329 = vst [vmem:[%s284_s23] sm:$0xff] (%p35_p3), %v328_v0  ;;  %331 = vst [vmem:[%s284_s23 + $0x8] sm:$0xff] (%p35_p3), %v330_v1  ;;  %v334_v3 = vld [vmem:[%s286_s22 + $0x30] sm:$0xff] (%p35_p3) }
  0x13   : > { %333 = vst [vmem:[%s284_s23 + $0x10] sm:$0xff] (%p35_p3), %v332_v2  ;;  %v336_v4 = vld [vmem:[%s286_s22 + $0x40] sm:$0xff] (%p35_p3)  ;;  %v338_v5 = vld [vmem:[%s286_s22 + $0x50] sm:$0xff] (%p35_p3)  ;;  %335 = vst [vmem:[%s284_s23 + $0x18] sm:$0xff] (%p35_p3), %v334_v3 }
  0x14   : > { %337 = vst [vmem:[%s284_s23 + $0x20] sm:$0xff] (%p35_p3), %v336_v4  ;;  %339 = vst [vmem:[%s284_s23 + $0x28] sm:$0xff] (%p35_p3), %v338_v5  ;;  %v340_v6 = vld [vmem:[%s286_s22 + $0x60] sm:$0xff] (%p35_p3)  ;;  %v342_v7 = vld [vmem:[%s286_s22 + $0x70] sm:$0xff] (%p35_p3) }
  0x15   : > { %341 = vst [vmem:[%s284_s23 + $0x30] sm:$0xff] %v340_v6  ;;  %343 = vst [vmem:[%s284_s23 + $0x38] sm:$0xff] %v342_v7 }
  0x16 PF: > { %p2086_p5 = scmp.ge.s32.totalorder %s2533_s11, 1  ;;  %p348_p6 = scmp.lt.s32.totalorder %s2533_s11, 3 }
  0x18   : > { %p349_p7 = pnand %p2086_p5, %p348_p6 }
  0x19   : > { %v2431_v8 = vld [vmem:[%s3012_s1] sm:$0xff] (!%p349_p7)   ;;  %v2432_v9 = vld [vmem:[%s3012_s1 + $0x8] sm:$0xff] (!%p349_p7)   ;;  %v2535_v10 = vmov (!%p349_p7), 0.0   ;;  %s355_s28 = sand.u32 (!%p349_p7), 1, %s2525_s30   ;;  %v2433_v11 = vld [vmem:[%s3012_s1 + $0x10] sm:$0xff] (!%p349_p7)   ;;  %vm2536_vm0 = vmmov (!%p349_p7), 0  }
  0x1a   : > { %352 = sbr.rel (%p349_p7) target bundleno = 10994 (0x2af2), region = 90  ;;  %2254 = vmatprep.subr.bf16.mxu1 (!%p349_p7), %v2535_v10  ;;  %2230 = vmatprep.subr.bf16.mxu0 (!%p349_p7), %v2431_v8  ;;  %s2087_s15 = sshll.u32 (!%p349_p7), %s355_s28, 6  ;;  %v2642_v12 = vld [vmem:[%s3013_s2] sm:$0xff] (!%p349_p7)   ;;  %v2434_v13 = vld [vmem:[%s3012_s1 + $0x18] sm:$0xff] (!%p349_p7)   ;;  %v2651_v14 = vld [vmem:[%s3013_s2 + $0x8] sm:$0xff] (!%p349_p7)   ;;  %v2537_v20 = vmov (!%p349_p7), 0  }
  0x1b   : > { %2231 = vmatpush3.bf16.msra.mxu0 (!%p349_p7), %v2431_v8  ;;  %2258 = vmatprep.mubr.msk.bf16.mxu1 (!%p349_p7), %vm2536_vm0, %v2535_v10  ;;  %s2654_s22 = scalar_lea.vmem (!%p349_p7), [#allocation5], %s2087_s15  ;;  %v2435_v17 = vld [vmem:[%s3012_s1 + $0x20] sm:$0xff] (!%p349_p7)   ;;  %v2436_v19 = vld [vmem:[%s3012_s1 + $0x28] sm:$0xff] (!%p349_p7)   ;;  %v2437_v21 = vld [vmem:[%s3012_s1 + $0x30] sm:$0xff] (!%p349_p7)   ;;  %s2538_s18 = smov (!%p349_p7), 64   ;;  %vm595_vm1 = vcmask (!%p349_p7), 261120  }
  0x1c   : > { %2232 = vmatprep.subr.bf16.mxu0 (!%p349_p7), %v2432_v9  ;;  %2255 = vmatpush3.bf16.msra.mxu1 (!%p349_p7), %v2642_v12  ;;  %v394_v15 = vld [vmem:[%s2654_s22] sm:$0xff] (!%p349_p7)  ;;  %v395_v16 = vld [vmem:[%s2654_s22 + $0x8] sm:$0xff] (!%p349_p7)  ;;  %v2439_v22 = vld [vmem:[%s3012_s1 + $0x38] sm:$0xff] (!%p349_p7)   ;;  %s2539_s30 = smov (!%p349_p7), 32   ;;  %p389_p8 = scmp.lt.s32.totalorder (!%p349_p7), %s2080_s12, 1 }
  0x1d   : > { %2256 = vmatprep.subr.bf16.mxu1 (!%p349_p7), %v2535_v10  ;;  %v2153_v18 = vpack.c.bf16 (!%p349_p7), %v395_v16, %v394_v15  ;;  %v396_v23 = vld [vmem:[%s2654_s22 + $0x10] sm:$0xff] (!%p349_p7)  ;;  %v397_v24 = vld [vmem:[%s2654_s22 + $0x18] sm:$0xff] (!%p349_p7)  ;;  %v2689_v30 = vld [vmem:[%s3014_s3] ss:$0 sm:$0xff] (!%p349_p7) }
  0x1e   : > { %v2154_v25 = vpack.c.bf16 (!%p349_p7), %v397_v24, %v396_v23 }
  0x1f   : > { %2233 = vmatpush3.bf16.msra.mxu0 (!%p349_p7), %v2432_v9  ;;  %2246 = vmatprep.mubr.bf16.mxu0 (!%p349_p7), %v2153_v18 }
  0x20   : > { %2234 = vmatprep.subr.bf16.mxu0 (!%p349_p7), %v2433_v11  ;;  %2257 = vmatpush3.bf16.msra.mxu1 (!%p349_p7), %v2651_v14 }
  0x21   : > { %2262 = vmatprep.subr.bf16.mxu1 %v2535_v10  ;;  %s3025_s12 = smov (!%p389_p8, %s2080_s12), 1 }
  0x22   : > { %s2088_s19 = sshll.u32 %s3025_s12, 3 }
  0x23   : > { %2235 = vmatpush3.bf16.msra.mxu0 %v2433_v11  ;;  %2259 = vmatmul.mubr.bf16.vlgmr.msra.gmra.mrb[0].mxu1 %v2537_v20 }
  0x24   : > { %2236 = vmatprep.subr.bf16.mxu0 %v2434_v13  ;;  %2263 = vmatpush3.bf16.msra.mxu1 %v2642_v12 }
  0x25   : > { %2266 = vmatprep.mubr.msk.bf16.mxu1 %vm2536_vm0, %v2535_v10  ;;  %2264 = vmatprep.subr.bf16.mxu1 %v2535_v10 }
  0x27   : > { %2237 = vmatpush3.bf16.msra.mxu0 %v2434_v13 }
  0x28   : > { %2238 = vmatprep.subr.bf16.mxu0 %v2435_v17  ;;  %2265 = vmatpush3.bf16.msra.mxu1 %v2651_v14 }
  0x29   : > { %2270 = vmatprep.subr.bf16.mxu1 %v2535_v10 }
  0x2b   : > { %2239 = vmatpush3.bf16.msra.mxu0 %v2435_v17 }
  0x2c   : > { %2240 = vmatprep.subr.bf16.mxu0 %v2436_v19 }
  0x2f   : > { %2241 = vmatpush3.bf16.msra.mxu0 %v2436_v19 }
  0x30   : > { %2242 = vmatprep.subr.bf16.mxu0 %v2437_v21 }
  0x33   : > { %2243 = vmatpush3.bf16.msra.mxu0 %v2437_v21 }
  0x34   : > { %2244 = vmatprep.subr.bf16.mxu0 %v2439_v22 }
  0x37   : > { %2245 = vmatpush3.bf16.msra.mxu0 %v2439_v22 }
  0x38   : > { %2294 = vmatprep.subr.bf16.mxu0 %v2535_v10 }
  0x3a   : > { %2247 = vmatmul.mubr.bf16.vlgmr.msra.gmra.mrb[0].mxu0 %v2154_v25 }
  0x3b   : > { %2295 = vmatpush3.bf16.msra.mxu0 %v2642_v12 }
  0x3c   : > { %2296 = vmatprep.subr.bf16.mxu0 %v2535_v10 }
  0x3f   : > { %2297 = vmatpush3.bf16.msra.mxu0 %v2651_v14 }
  0x40   : > { %2310 = vmatprep.subr.bf16.mxu0 %v2535_v10 }
  0xf6   : > { %v633_v26 = vpop.f32.mrb[0].mxu1 }
  0xf7   : > { %v2260_v27 = vpop.f32.mrb[1].mxu1 }
  0xf8   : > { %v636_v28 = vpop.f32.mrb[2].mxu1 }
  0xf9   : > { %v2261_v29 = vpop.f32.mrb[3].mxu1 }
 0x10d   : > { %v2691_v31 = vpop.f32.mrb[0].mxu0 }
 0x10e   : > { %v539_v32 = vpop.f32.mrb[1].mxu0  ;;  %v548_v13 = vadd.f32 %v2691_v31, %v2689_v30 }
 0x10f   : > { %v540_v33 = vadd.f32 %v2689_v30, %v539_v32  ;;  %v2694_v34 = vpop.f32.mrb[2].mxu0 }
 0x110   : > { %v542_v35 = vpop.f32.mrb[3].mxu0 }
 0x111   : > { %v639_v36 = vadd.f32 %v633_v26, %v540_v33  ;;  %v543_v53 = vadd.f32 %v2689_v30, %v542_v35 }
 0x113   : > { %v640_v37 = vmul.f32 0.5, %v639_v36 }
 0x115   : > { %2447 = vtanh.f32 %v640_v37 }
 0x11f   : > { %v2448_v38 = vpop.eup %2447 }
 0x120   : > { %v642_v39 = vmul.f32 0.5, %v2448_v38 }
 0x122   : > { %v643_v40 = vadd.f32 0.5, %v642_v39  ;;  %v551_v39 = vadd.f32 %v2694_v34, %v2689_v30 }
 0x124   : > { %v644_v41 = vmul.f32 2.0, %v643_v40  ;;  %v646_v45 = vmul.f32 0.0, %v643_v40 }
 0x126   : > { %v2104_v42 = vadd.f32 -1.0, %v644_v41 }
 0x128   : > { %648 = vrot.lane.b32.xlu0 %v2104_v42, %s2538_s18 }
 0x19a   : > { %v649_v43 = vpop.permute.xlu0 %648 }
 0x19b   : > { %v651_v44 = vmul.f32 %v649_v43, %v643_v40 }
 0x19d   : > { %653 = vrot.lane.b32.xlu0 %v651_v44, %s2539_s30 }
 0x20f   : > { %v654_v46 = vpop.permute.xlu0 %653 }
 0x210   : > { %v656_v47 = vadd.f32 %v654_v46, %v646_v45 }
 0x212   : > { %2449 = vtanh.f32 %v656_v47 }
 0x21c   : > { %v2450_v48 = vpop.eup %2449 }
 0x21d   : > { %659 = vrot.lane.b32.xlu1 %v2450_v48, %s2538_s18 }
 0x28f   : > { %v660_v49 = vpop.permute.xlu1 %659 }
 0x290   : > { %v2699_v50 = vmul.f32 %v660_v49, %v643_v40 }
 0x292   : > { %v670_v51 = vpack.c.bf16 %v2699_v50, %v2699_v50 }
 0x294   : > { %672 = vrot.lane.b32.xlu1 %v670_v51, %s2539_s30 }
 0x306   : > { %v673_v52 = vpop.permute.xlu1 %672 }
 0x307   : > { %2267 = vmatmul.mubr.msk.bf16.vlgmr.msra.gmra.mrb[4].mxu1 %vm595_vm1, %v673_v52 }
 0x308   : > { %2271 = vmatpush3.bf16.msra.mxu1 %v2642_v12  ;;  %2274 = vmatprep.mubr.msk.bf16.mxu1 %vm2536_vm0, %v2535_v10 }
 0x309   : > { %2272 = vmatprep.subr.bf16.mxu1 %v2535_v10 }
 0x30c   : > { %2273 = vmatpush3.bf16.msra.mxu1 %v2651_v14 }
 0x30d   : > { %2278 = vmatprep.subr.bf16.mxu1 %v2535_v10 }
 0x3da   : > { %v711_v54 = vpop.f32.mrb[4].mxu1 }
 0x3db   : > { %v717_v55 = vadd.f32 %v711_v54, %v543_v53  ;;  %v2268_v56 = vpop.f32.mrb[5].mxu1 }
 0x3dc   : > { %v714_v57 = vpop.f32.mrb[6].mxu1  ;;  %v398_v56 = vld [vmem:[%s2654_s22 + $0x20] sm:$0xff] }
 0x3dd   : > { %v718_v58 = vmul.f32 0.5, %v717_v55  ;;  %v2269_v59 = vpop.f32.mrb[7].mxu1  ;;  %v399_v57 = vld [vmem:[%s2654_s22 + $0x28] sm:$0xff] }
 0x3de   : > { %v2155_v59 = vpack.c.bf16 %v399_v57, %v398_v56 }
 0x3df   : > { %2451 = vtanh.f32 %v718_v58  ;;  %v400_v58 = vld [vmem:[%s2654_s22 + $0x30] sm:$0xff] }
 0x3e0   : > { %2250 = vmatprep.mubr.bf16.mxu0 %v2155_v59 }
 0x3e9   : > { %v2452_v60 = vpop.eup %2451 }
 0x3ea   : > { %v720_v61 = vmul.f32 0.5, %v2452_v60  ;;  %v401_v60 = vld [vmem:[%s2654_s22 + $0x38] sm:$0xff] }
 0x3ec   : > { %v721_v62 = vadd.f32 0.5, %v720_v61  ;;  %v2156_v61 = vpack.c.bf16 %v401_v60, %v400_v58 }
 0x3ee   : > { %v722_v63 = vmul.f32 2.0, %v721_v62  ;;  %v724_v3 = vmul.f32 %v721_v62, %v656_v47  ;;  %2251 = vmatmul.mubr.bf16.gmra.mrb[4].mxu0 %v2156_v61 }
 0x3ef   : > { %2298 = vmatprep.mubr.msk.bf16.mxu0 %vm2536_vm0, %v2535_v10 }
 0x3f0   : > { %v2106_v0 = vadd.f32 -1.0, %v722_v63 }
 0x3f2   : > { %726 = vrot.lane.b32.xlu0 %v2106_v0, %s2538_s18 }
 0x464   : > { %v727_v1 = vpop.permute.xlu0 %726 }
 0x465   : > { %v729_v2 = vmul.f32 %v727_v1, %v721_v62 }
 0x467   : > { %731 = vrot.lane.b32.xlu1 %v729_v2, %s2539_s30 }
 0x4c1   : > { %v2760_v2 = vpop.f32.mrb[4].mxu0 }
 0x4c2   : > { %v564_v57 = vadd.f32 %v2760_v2, %v2689_v30 }
 0x4d9   : > { %v732_v4 = vpop.permute.xlu1 %731 }
 0x4da   : > { %v734_v5 = vadd.f32 %v732_v4, %v724_v3  ;;  %v555_v3 = vpop.f32.mrb[5].mxu0 }
 0x4db   : > { %v2762_v4 = vpop.f32.mrb[6].mxu0 }
 0x4dc   : > { %2453 = vtanh.f32 %v734_v5 }
 0x4e6   : > { %v2454_v6 = vpop.eup %2453 }
 0x4e7   : > { %737 = vrot.lane.b32.xlu0 %v2454_v6, %s2538_s18 }
 0x559   : > { %v738_v7 = vpop.permute.xlu0 %737 }
 0x55a   : > { %v2715_v8 = vmul.f32 %v738_v7, %v721_v62  ;;  %v556_v7 = vadd.f32 %v2689_v30, %v555_v3 }
 0x55c   : > { %v749_v9 = vpack.c.bf16 %v2715_v8, %v2715_v8 }
 0x55e   : > { %751 = vrot.lane.b32.xlu1 %v749_v9, %s2539_s30 }
 0x5d0   : > { %v752_v11 = vpop.permute.xlu1 %751 }
 0x5d1   : > { %2275 = vmatmul.mubr.msk.bf16.vlgmr.msra.gmra.mrb[8].mxu1 %vm595_vm1, %v752_v11 }
 0x5d2   : > { %2279 = vmatpush3.bf16.msra.mxu1 %v2642_v12  ;;  %2282 = vmatprep.mubr.msk.bf16.mxu1 %vm2536_vm0, %v2535_v10 }
 0x5d3   : > { %2280 = vmatprep.subr.bf16.mxu1 %v2535_v10 }
 0x5d6   : > { %2281 = vmatpush3.bf16.msra.mxu1 %v2651_v14 }
 0x5d7   : > { %2286 = vmatprep.subr.bf16.mxu1 %v2535_v10 }
 0x6a4   : > { %v790_v15 = vpop.f32.mrb[8].mxu1 }
 0x6a5   : > { %v796_v16 = vadd.f32 %v790_v15, %v548_v13  ;;  %v2276_v17 = vpop.f32.mrb[9].mxu1 }
 0x6a6   : > { %v793_v18 = vpop.f32.mrb[10].mxu1 }
 0x6a7   : > { %v797_v19 = vmul.f32 0.5, %v796_v16  ;;  %v2277_v21 = vpop.f32.mrb[11].mxu1 }
 0x6a9   : > { %2455 = vtanh.f32 %v797_v19 }
 0x6b3   : > { %v2456_v22 = vpop.eup %2455 }
 0x6b4   : > { %v799_v23 = vmul.f32 0.5, %v2456_v22 }
 0x6b6   : > { %v800_v24 = vadd.f32 0.5, %v799_v23 }
 0x6b8   : > { %v801_v25 = vmul.f32 2.0, %v800_v24  ;;  %v803_v29 = vmul.f32 %v800_v24, %v734_v5  ;;  %v558_v5 = vpop.f32.mrb[7].mxu0 }
 0x6ba   : > { %v2108_v26 = vadd.f32 -1.0, %v801_v25 }
 0x6bc   : > { %805 = vrot.lane.b32.xlu0 %v2108_v26, %s2538_s18 }
 0x72e   : > { %v806_v27 = vpop.permute.xlu0 %805 }
 0x72f   : > { %v808_v28 = vmul.f32 %v806_v27, %v800_v24 }
 0x731   : > { %810 = vrot.lane.b32.xlu1 %v808_v28, %s2539_s30 }
 0x7a3   : > { %v811_v31 = vpop.permute.xlu1 %810 }
 0x7a4   : > { %v813_v32 = vadd.f32 %v811_v31, %v803_v29 }
 0x7a6   : > { %2457 = vtanh.f32 %v813_v32 }
 0x7b0   : > { %v2458_v33 = vpop.eup %2457 }
 0x7b1   : > { %816 = vrot.lane.b32.xlu0 %v2458_v33, %s2538_s18 }
 0x823   : > { %v817_v35 = vpop.permute.xlu0 %816 }
 0x824   : > { %v2732_v36 = vmul.f32 %v817_v35, %v800_v24 }
 0x826   : > { %v828_v37 = vpack.c.bf16 %v2732_v36, %v2732_v36 }
 0x828   : > { %830 = vrot.lane.b32.xlu1 %v828_v37, %s2539_s30  ;;  %v559_v37 = vadd.f32 %v2689_v30, %v558_v5 }
 0x89a   : > { %v831_v38 = vpop.permute.xlu1 %830 }
 0x89b   : > { %2283 = vmatmul.mubr.msk.bf16.vlgmr.msra.gmra.mrb[12].mxu1 %vm595_vm1, %v831_v38 }
 0x89c   : > { %2287 = vmatpush3.bf16.msra.mxu1 %v2642_v12  ;;  %2290 = vmatprep.mubr.msk.bf16.mxu1 %vm2536_vm0, %v2535_v10 }
 0x89d   : > { %2288 = vmatprep.subr.bf16.mxu1 %v2535_v10 }
 0x8a0   : > { %2289 = vmatpush3.bf16.msra.mxu1 %v2651_v14 }
 0x8a1   : > { %2302 = vmatprep.subr.bf16.mxu1 %v2535_v10 }
 0x96e   : > { %v869_v40 = vpop.f32.mrb[12].mxu1 }
 0x96f   : > { %v875_v41 = vadd.f32 %v869_v40, %v551_v39  ;;  %v2284_v42 = vpop.f32.mrb[13].mxu1 }
 0x970   : > { %v872_v43 = vpop.f32.mrb[14].mxu1 }
 0x971   : > { %v876_v44 = vmul.f32 0.5, %v875_v41  ;;  %v2285_v45 = vpop.f32.mrb[15].mxu1 }
 0x973   : > { %2459 = vtanh.f32 %v876_v44 }
 0x97d   : > { %v2460_v46 = vpop.eup %2459 }
 0x97e   : > { %v878_v47 = vmul.f32 0.5, %v2460_v46 }
 0x980   : > { %v879_v48 = vadd.f32 0.5, %v878_v47 }
 0x982   : > { %v880_v49 = vmul.f32 2.0, %v879_v48  ;;  %v882_v53 = vmul.f32 %v879_v48, %v813_v32 }
 0x984   : > { %v2110_v51 = vadd.f32 -1.0, %v880_v49 }
 0x986   : > { %884 = vrot.lane.b32.xlu0 %v2110_v51, %s2538_s18 }
 0x9f8   : > { %v885_v52 = vpop.permute.xlu0 %884 }
 0x9f9   : > { %v887_v34 = vmul.f32 %v885_v52, %v879_v48 }
 0x9fb   : > { %889 = vrot.lane.b32.xlu1 %v887_v34, %s2539_s30 }
 0xa6d   : > { %v890_v54 = vpop.permute.xlu1 %889 }
 0xa6e   : > { %v892_v55 = vadd.f32 %v890_v54, %v882_v53 }
 0xa70   : > { %2461 = vtanh.f32 %v892_v55 }
 0xa7a   : > { %v2462_v62 = vpop.eup %2461 }
 0xa7b   : > { %895 = vrot.lane.b32.xlu0 %v2462_v62, %s2538_s18 }
 0xaed   : > { %v896_v63 = vpop.permute.xlu0 %895 }
 0xaee   : > { %v2755_v0 = vmul.f32 %v896_v63, %v879_v48 }
 0xaf0   : > { %v907_v1 = vpack.c.bf16 %v2755_v0, %v2755_v0 }
 0xaf2   : > { %909 = vrot.lane.b32.xlu1 %v907_v1, %s2539_s30 }
 0xb64   : > { %v910_v6 = vpop.permute.xlu1 %909 }
 0xb65   : > { %2291 = vmatmul.mubr.msk.bf16.vlgmr.msra.gmra.mrb[16].mxu1 %vm595_vm1, %v910_v6 }
 0xb66   : > { %2303 = vmatpush3.bf16.msra.mxu1 %v2642_v12  ;;  %2306 = vmatprep.mubr.msk.bf16.mxu1 %vm2536_vm0, %v2535_v10 }
 0xb67   : > { %2304 = vmatprep.subr.bf16.mxu1 %v2535_v10 }
 0xb6a   : > { %2305 = vmatpush3.bf16.msra.mxu1 %v2651_v14 }
 0xc38   : > { %v948_v9 = vpop.f32.mrb[16].mxu1 }
 0xc39   : > { %v954_v11 = vadd.f32 %v948_v9, %v556_v7  ;;  %v2292_v13 = vpop.f32.mrb[17].mxu1 }
 0xc3a   : > { %v951_v15 = vpop.f32.mrb[18].mxu1 }
 0xc3b   : > { %v955_v16 = vmul.f32 0.5, %v954_v11  ;;  %v2293_v17 = vpop.f32.mrb[19].mxu1 }
 0xc3d   : > { %2463 = vtanh.f32 %v955_v16 }
 0xc47   : > { %v2464_v18 = vpop.eup %2463 }
 0xc48   : > { %v957_v19 = vmul.f32 0.5, %v2464_v18  ;;  %v2441_v18 = vld [vmem:[%s3015_s4] sm:$0xff]  }
 0xc49   : > { %2318 = vmatprep.subr.bf16.mxu1 %v2441_v18 }
 0xc4a   : > { %v958_v21 = vadd.f32 0.5, %v957_v19 }
 0xc4c   : > { %v959_v22 = vmul.f32 2.0, %v958_v21  ;;  %v961_v26 = vmul.f32 %v958_v21, %v892_v55 }
 0xc4e   : > { %v2112_v23 = vadd.f32 -1.0, %v959_v22 }
 0xc50   : > { %963 = vrot.lane.b32.xlu0 %v2112_v23, %s2538_s18 }
 0xcc2   : > { %v964_v24 = vpop.permute.xlu0 %963 }
 0xcc3   : > { %v966_v25 = vmul.f32 %v964_v24, %v958_v21 }
 0xcc5   : > { %968 = vrot.lane.b32.xlu1 %v966_v25, %s2539_s30 }
 0xd37   : > { %v969_v27 = vpop.permute.xlu1 %968 }
 0xd38   : > { %v971_v28 = vadd.f32 %v969_v27, %v961_v26 }
 0xd3a   : > { %2465 = vtanh.f32 %v971_v28 }
 0xd44   : > { %v2466_v29 = vpop.eup %2465 }
 0xd45   : > { %974 = vrot.lane.b32.xlu0 %v2466_v29, %s2538_s18  ;;  %v2832_v29 = vld [vmem:[%s3016_s5] sm:$0xff]  }
 0xdb7   : > { %v975_v31 = vpop.permute.xlu0 %974 }
 0xdb8   : > { %v2774_v32 = vmul.f32 %v975_v31, %v958_v21  ;;  %v2840_v31 = vld [vmem:[%s3016_s5 + $0x8] sm:$0xff]  }
 0xdba   : > { %v986_v33 = vpack.c.bf16 %v2774_v32, %v2774_v32 }
 0xdbc   : > { %988 = vrot.lane.b32.xlu1 %v986_v33, %s2539_s30 }
 0xe2e   : > { %v989_v35 = vpop.permute.xlu1 %988 }
 0xe2f   : > { %2299 = vmatmul.mubr.msk.bf16.vlgmr.msra.gmra.mrb[8].mxu0 %vm595_vm1, %v989_v35 }
 0xe30   : > { %2311 = vmatpush3.bf16.msra.mxu0 %v2642_v12  ;;  %2314 = vmatprep.mubr.msk.bf16.mxu0 %vm2536_vm0, %v2535_v10 }
 0xe31   : > { %2312 = vmatprep.subr.bf16.mxu0 %v2535_v10 }
 0xe34   : > { %2313 = vmatpush3.bf16.msra.mxu0 %v2651_v14 }
 0xe35   : > { %2330 = vmatprep.subr.bf16.mxu0 %v2535_v10 }
 0xf02   : > { %v1027_v38 = vpop.f32.mrb[8].mxu0 }
 0xf03   : > { %v1033_v39 = vadd.f32 %v1027_v38, %v559_v37  ;;  %v2300_v40 = vpop.f32.mrb[9].mxu0 }
 0xf04   : > { %v1030_v41 = vpop.f32.mrb[10].mxu0 }
 0xf05   : > { %v1034_v42 = vmul.f32 0.5, %v1033_v39  ;;  %v2301_v43 = vpop.f32.mrb[11].mxu0 }
 0xf07   : > { %2467 = vtanh.f32 %v1034_v42 }
 0xf11   : > { %v2468_v44 = vpop.eup %2467 }
 0xf12   : > { %v1036_v12 = vmul.f32 0.5, %v2468_v44 }
 0xf14   : > { %v1037_v45 = vadd.f32 0.5, %v1036_v12  ;;  %v2869_v12 = vld [vmem:[%s3017_s6] ss:$0 sm:$0xff] }
 0xf16   : > { %v1038_v46 = vmul.f32 2.0, %v1037_v45  ;;  %v1040_v49 = vmul.f32 %v1037_v45, %v971_v28 }
 0xf18   : > { %v2114_v47 = vadd.f32 -1.0, %v1038_v46 }
 0xf1a   : > { %1042 = vrot.lane.b32.xlu0 %v2114_v47, %s2538_s18 }
 0xf8c   : > { %v1043_v48 = vpop.permute.xlu0 %1042 }
 0xf8d   : > { %v1045_v14 = vmul.f32 %v1043_v48, %v1037_v45 }
 0xf8f   : > { %1047 = vrot.lane.b32.xlu1 %v1045_v14, %s2539_s30 }
0x1001   : > { %v1048_v51 = vpop.permute.xlu1 %1047 }
0x1002   : > { %v1050_v52 = vadd.f32 %v1048_v51, %v1040_v49 }
0x1004   : > { %2469 = vtanh.f32 %v1050_v52 }
0x100e   : > { %v2470_v34 = vpop.eup %2469 }
0x100f   : > { %1053 = vrot.lane.b32.xlu0 %v2470_v34, %s2538_s18 }
0x1081   : > { %v1054_v53 = vpop.permute.xlu0 %1053 }
0x1082   : > { %v2790_v54 = vmul.f32 %v1054_v53, %v1037_v45 }
0x1084   : > { %v1065_v55 = vpack.c.bf16 %v2790_v54, %v2790_v54 }
0x1086   : > { %1067 = vrot.lane.b32.xlu1 %v1065_v55, %s2539_s30 }
0x10f8   : > { %v1068_v56 = vpop.permute.xlu1 %1067 }
0x10f9   : > { %2307 = vmatmul.mubr.msk.bf16.vlgmr.msra.gmra.mrb[20].mxu1 %vm595_vm1, %v1068_v56 }
0x10fa   : > { %2319 = vmatpush3.bf16.msra.mxu1 %v2441_v18 }
0x11cc   : > { %v1106_v58 = vpop.f32.mrb[20].mxu1 }
0x11cd   : > { %v1112_v59 = vadd.f32 %v1106_v58, %v564_v57  ;;  %v2308_v60 = vpop.f32.mrb[21].mxu1 }
0x11ce   : > { %v1109_v61 = vpop.f32.mrb[22].mxu1 }
0x11cf   : > { %v1113_v62 = vmul.f32 0.5, %v1112_v59  ;;  %v2309_v63 = vpop.f32.mrb[23].mxu1 }
0x11d1   : > { %2471 = vtanh.f32 %v1113_v62 }
0x11db   : > { %v2472_v1 = vpop.eup %2471 }
0x11dc   : > { %v1115_v3 = vmul.f32 0.5, %v2472_v1 }
0x11de   : > { %v1116_v5 = vadd.f32 0.5, %v1115_v3 }
0x11e0   : > { %v1117_v6 = vmul.f32 2.0, %v1116_v5  ;;  %v1119_v2 = vmul.f32 %v1116_v5, %v1050_v52 }
0x11e2   : > { %v2116_v7 = vadd.f32 -1.0, %v1117_v6 }
0x11e4   : > { %1121 = vrot.lane.b32.xlu0 %v2116_v7, %s2538_s18 }
0x1256   : > { %v1122_v9 = vpop.permute.xlu0 %1121 }
0x1257   : > { %v1124_v11 = vmul.f32 %v1122_v9, %v1116_v5 }
0x1259   : > { %1126 = vrot.lane.b32.xlu1 %v1124_v11, %s2539_s30 }
0x125d   : > { %664 = vrot.lane.b32.xlu1 %v2699_v50, %s2539_s30  ;;  %v2442_v50 = vld [vmem:[%s3015_s4 + $0x8] sm:$0xff]  }
0x125e   : > { %2320 = vmatprep.subr.bf16.mxu1 %v2442_v50 }
0x125f   : > { %2321 = vmatpush3.bf16.msra.mxu1 %v2442_v50 }
0x1260   : > { %2346 = vmatprep.subr.bf16.mxu1 %v2535_v10 }
0x1261   : > { %821 = vrot.lane.b32.xlu1 %v2732_v36, %s2539_s30 }
0x12cb   : > { %v1127_v13 = vpop.permute.xlu1 %1126 }
0x12cc   : > { %v2804_v15 = vadd.f32 %v1127_v13, %v1119_v2 }
0x12ce   : > { %2473 = vtanh.f32 %v2804_v15 }
0x12cf   : > { %v665_v16 = vpop.permute.xlu1 %664 }
0x12d0   : > { %667 = vst.msk [vmem:[#allocation3] sm:$0xff] %vm595_vm1, %v665_v16 }
0x12d3   : > { %v822_v17 = vpop.permute.xlu1 %821 }
0x12d4   : > { %825 = vst.msk [vmem:[#allocation3 + $0x10] sm:$0xff] %vm595_vm1, %v822_v17 }
0x12d7   : > { %v1221_v25 = vld [vmem:[#allocation3] sm:$0xff] }
0x12d8   : > { %v2474_v36 = vpop.eup %2473 }
0x12d9   : > { %1132 = vrot.lane.b32.xlu0 %v2474_v36, %s2538_s18 }
0x12dd   : > { %742 = vrot.lane.b32.xlu0 %v2715_v8, %s2539_s30 }
0x12e1   : > { %900 = vrot.lane.b32.xlu0 %v2755_v0, %s2539_s30  ;;  %v1223_v0 = vld [vmem:[#allocation3 + $0x10] sm:$0xff] }
0x134b   : > { %v1133_v19 = vpop.permute.xlu0 %1132 }
0x134c   : > { %v2821_v21 = vmul.f32 %v1133_v19, %v1116_v5 }
0x134e   : > { %v1144_v22 = vpack.c.bf16 %v2821_v21, %v2821_v21 }
0x134f   : > { %v743_v23 = vpop.permute.xlu0 %742 }
0x1350   : > { %746 = vst.msk [vmem:[#allocation3 + $0x8] sm:$0xff] %vm595_vm1, %v743_v23  ;;  %1146 = vrot.lane.b32.xlu1 %v1144_v22, %s2539_s30 }
0x1353   : > { %v901_v24 = vpop.permute.xlu0 %900 }
0x1354   : > { %904 = vst.msk [vmem:[#allocation3 + $0x18] sm:$0xff] %vm595_vm1, %v901_v24 }
0x1357   : > { %v1222_v26 = vld [vmem:[#allocation3 + $0x8] sm:$0xff] }
0x1358   : > { %v2157_v8 = vpack.c.bf16 %v1222_v26, %v1221_v25 }
0x135a   : > { %2322 = vmatprep.mubr.msk.bf16.mxu1 %vm595_vm1, %v2157_v8 }
0x135b   : > { %v1224_v27 = vld [vmem:[#allocation3 + $0x18] sm:$0xff] }
0x135c   : > { %v2158_v28 = vpack.c.bf16 %v1224_v27, %v1223_v0 }
0x135e   : > { %2323 = vmatmul.mubr.msk.bf16.vlgmr.msra.gmra.mrb[24].mxu1 %vm595_vm1, %v2158_v28 }
0x135f   : > { %2347 = vmatpush3.bf16.msra.mxu1 %v2832_v29 }
0x1360   : > { %2348 = vmatprep.subr.bf16.mxu1 %v2535_v10 }
0x1363   : > { %2349 = vmatpush3.bf16.msra.mxu1 %v2840_v31 }
0x1364   : > { %2362 = vmatprep.subr.bf16.mxu1 %v2535_v10 }
0x13c2   : > { %v1147_v33 = vpop.permute.xlu1 %1146 }
0x13c3   : > { %2315 = vmatmul.mubr.msk.bf16.vlgmr.msra.gmra.mrb[12].mxu0 %vm595_vm1, %v1147_v33 }
0x13c4   : > { %2331 = vmatpush3.bf16.msra.mxu0 %v2832_v29  ;;  %2334 = vmatprep.mubr.msk.bf16.mxu0 %vm2536_vm0, %v2535_v10 }
0x13c5   : > { %2332 = vmatprep.subr.bf16.mxu0 %v2535_v10 }
0x13c8   : > { %2333 = vmatpush3.bf16.msra.mxu0 %v2840_v31 }
0x13c9   : > { %2338 = vmatprep.subr.bf16.mxu0 %v2535_v10 }
0x13cb   : > { %2335 = vmatmul.mubr.bf16.vlgmr.msra.gmra.mrb[16].mxu0 %v2537_v20  ;;  %v567_v20 = vadd.f32 %v2762_v4, %v2689_v30 }
0x13cc   : > { %2339 = vmatpush3.bf16.msra.mxu0 %v2832_v29  ;;  %2342 = vmatprep.mubr.msk.bf16.mxu0 %vm2536_vm0, %v2535_v10 }
0x13cd   : > { %2340 = vmatprep.subr.bf16.mxu0 %v2535_v10 }
0x13d0   : > { %2341 = vmatpush3.bf16.msra.mxu0 %v2840_v31 }
0x13d1   : > { %2354 = vmatprep.subr.bf16.mxu0 %v2535_v10 }
0x1431   : > { %v2858_v35 = vpop.f32.mrb[24].mxu1 }
0x1432   : > { %v1326_v37 = vpop.f32.mrb[25].mxu1 }
0x1433   : > { %v2860_v38 = vpop.f32.mrb[26].mxu1  ;;  %v1327_v45 = vadd.f32 %v2869_v12, %v1326_v37 }
0x1434   : > { %v2862_v39 = vpop.f32.mrb[27].mxu1 }
0x1435   : > { %v1330_v22 = vadd.f32 %v2869_v12, %v2862_v39 }
0x1496   : > { %v1185_v40 = vpop.f32.mrb[12].mxu0 }
0x1497   : > { %v1191_v41 = vadd.f32 %v1185_v40, %v567_v20  ;;  %v2316_v42 = vpop.f32.mrb[13].mxu0 }
0x1498   : > { %v1188_v43 = vpop.f32.mrb[14].mxu0 }
0x1499   : > { %v2317_v44 = vpop.f32.mrb[15].mxu0  ;;  %v1192_v57 = vmul.f32 0.5, %v1191_v41 }
0x149e   : > { %v1416_v46 = vpop.f32.mrb[16].mxu0 }
0x149f   : > { %v1422_v47 = vadd.f32 %v1416_v46, %v1327_v45  ;;  %v2336_v48 = vpop.f32.mrb[17].mxu0 }
0x14a0   : > { %v1419_v14 = vpop.f32.mrb[18].mxu0 }
0x14a1   : > { %v1423_v49 = vmul.f32 0.5, %v1422_v47  ;;  %v2337_v51 = vpop.f32.mrb[19].mxu0 }
0x14a3   : > { %2475 = vtanh.f32 %v1423_v49 }
0x14a4   : > { %2477 = vtanh.f32 %v1192_v57  ;;  %v1335_v57 = vadd.f32 %v2858_v35, %v2869_v12 }
0x14ad   : > { %v2476_v30 = vpop.eup %2475 }
0x14ae   : > { %v1425_v4 = vmul.f32 0.5, %v2476_v30  ;;  %v2478_v60 = vpop.eup %2477 }
0x14af   : > { %v1194_v62 = vmul.f32 0.5, %v2478_v60 }
0x14b0   : > { %v1426_v52 = vadd.f32 0.5, %v1425_v4 }
0x14b1   : > { %v1195_v63 = vadd.f32 0.5, %v1194_v62 }
0x14b2   : > { %v1427_v34 = vmul.f32 2.0, %v1426_v52  ;;  %v1429_v58 = vmul.f32 0.0, %v1426_v52 }
0x14b3   : > { %v1196_v1 = vmul.f32 2.0, %v1195_v63  ;;  %v1198_v16 = vmul.f32 %v1195_v63, %v2804_v15 }
0x14b4   : > { %v2132_v53 = vadd.f32 -1.0, %v1427_v34 }
0x14b5   : > { %v2118_v5 = vadd.f32 -1.0, %v1196_v1 }
0x14b6   : > { %1431 = vrot.lane.b32.xlu0 %v2132_v53, %s2538_s18 }
0x1528   : > { %v1432_v55 = vpop.permute.xlu0 %1431 }
0x1529   : > { %v1434_v56 = vmul.f32 %v1432_v55, %v1426_v52 }
0x152b   : > { %1436 = vrot.lane.b32.xlu1 %v1434_v56, %s2539_s30 }
0x159d   : > { %v1437_v59 = vpop.permute.xlu1 %1436 }
0x159e   : > { %v1439_v61 = vadd.f32 %v1437_v59, %v1429_v58 }
0x15a0   : > { %2479 = vtanh.f32 %v1439_v61 }
0x15aa   : > { %v2480_v3 = vpop.eup %2479 }
0x15ab   : > { %1442 = vrot.lane.b32.xlu0 %v2480_v3, %s2538_s18 }
0x15af   : > { %1200 = vrot.lane.b32.xlu0 %v2118_v5, %s2538_s18 }
0x161d   : > { %v1443_v6 = vpop.permute.xlu0 %1442 }
0x161e   : > { %v1445_v7 = vmul.f32 %v1443_v6, %v1426_v52 }
0x1620   : > { %v1447_v9 = vpack.c.bf16 %v1445_v7, %v1445_v7 }
0x1621   : > { %v1201_v11 = vpop.permute.xlu0 %1200 }
0x1622   : > { %v1203_v2 = vmul.f32 %v1201_v11, %v1195_v63  ;;  %1449 = vrot.lane.b32.xlu1 %v1447_v9, %s2539_s30 }
0x1624   : > { %1205 = vrot.lane.b32.xlu0 %v1203_v2, %s2539_s30 }
0x1694   : > { %v1450_v13 = vpop.permute.xlu1 %1449 }
0x1695   : > { %2343 = vmatmul.mubr.msk.bf16.vlgmr.msra.gmra.mrb[20].mxu0 %vm595_vm1, %v1450_v13 }
0x1696   : > { %v1206_v17 = vpop.permute.xlu0 %1205  ;;  %2355 = vmatpush3.bf16.msra.mxu0 %v2832_v29  ;;  %2358 = vmatprep.mubr.msk.bf16.mxu0 %vm2536_vm0, %v2535_v10 }
0x1697   : > { %v1208_v18 = vadd.f32 %v1206_v17, %v1198_v16  ;;  %2356 = vmatprep.subr.bf16.mxu0 %v2535_v10 }
0x1699   : > { %2481 = vtanh.f32 %v1208_v18 }
0x169a   : > { %2357 = vmatpush3.bf16.msra.mxu0 %v2840_v31 }
0x169b   : > { %2370 = vmatprep.subr.bf16.mxu0 %v2535_v10 }
0x16a3   : > { %v2482_v50 = vpop.eup %2481 }
0x16a4   : > { %1211 = vrot.lane.b32.xlu0 %v2482_v50, %s2538_s18 }
0x16a8   : > { %979 = vrot.lane.b32.xlu0 %v2774_v32, %s2539_s30 }
0x16ac   : > { %1137 = vrot.lane.b32.xlu0 %v2821_v21, %s2539_s30 }
0x1716   : > { %v1212_v15 = vpop.permute.xlu0 %1211 }
0x1717   : > { %v1214_v43 = vmul.f32 %v1212_v15, %v1195_v63 }
0x171a   : > { %v980_v36 = vpop.permute.xlu0 %979 }
0x171b   : > { %983 = vst.msk [vmem:[#allocation3 + $0x20] sm:$0xff] %vm595_vm1, %v980_v36  ;;  %v1338_v36 = vadd.f32 %v2860_v38, %v2869_v12 }
0x171e   : > { %v1138_v19 = vpop.permute.xlu0 %1137 }
0x171f   : > { %1141 = vst.msk [vmem:[#allocation3 + $0x30] sm:$0xff] %vm595_vm1, %v1138_v19 }
0x1722   : > { %v1225_v14 = vld [vmem:[#allocation3 + $0x20] sm:$0xff] }
0x1768   : > { %v1488_v23 = vpop.f32.mrb[20].mxu0 }
0x1769   : > { %v1494_v24 = vadd.f32 %v1488_v23, %v1330_v22  ;;  %v2344_v25 = vpop.f32.mrb[21].mxu0 }
0x176a   : > { %v1491_v26 = vpop.f32.mrb[22].mxu0 }
0x176b   : > { %v1495_v8 = vmul.f32 0.5, %v1494_v24  ;;  %v2345_v0 = vpop.f32.mrb[23].mxu0 }
0x176d   : > { %2483 = vtanh.f32 %v1495_v8 }
0x1777   : > { %v2484_v32 = vpop.eup %2483 }
0x1778   : > { %v1497_v27 = vmul.f32 0.5, %v2484_v32 }
0x177a   : > { %v1498_v21 = vadd.f32 0.5, %v1497_v27 }
0x177c   : > { %v1499_v28 = vmul.f32 2.0, %v1498_v21  ;;  %v1501_v40 = vmul.f32 %v1498_v21, %v1439_v61 }
0x177e   : > { %v2134_v33 = vadd.f32 -1.0, %v1499_v28 }
0x1780   : > { %1503 = vrot.lane.b32.xlu1 %v2134_v33, %s2538_s18 }
0x17f2   : > { %v1504_v37 = vpop.permute.xlu1 %1503 }
0x17f3   : > { %v1506_v20 = vmul.f32 %v1504_v37, %v1498_v21 }
0x17f5   : > { %1508 = vrot.lane.b32.xlu1 %v1506_v20, %s2539_s30 }
0x1867   : > { %v1509_v39 = vpop.permute.xlu1 %1508 }
0x1868   : > { %v1511_v41 = vadd.f32 %v1509_v39, %v1501_v40 }
0x186a   : > { %2485 = vtanh.f32 %v1511_v41 }
0x1874   : > { %v2486_v42 = vpop.eup %2485 }
0x1875   : > { %1514 = vrot.lane.b32.xlu1 %v2486_v42, %s2538_s18 }
0x1879   : > { %1058 = vrot.lane.b32.xlu1 %v2790_v54, %s2539_s30  ;;  %v1227_v54 = vld [vmem:[#allocation3 + $0x30] sm:$0xff] }
0x187d   : > { %1216 = vrot.lane.b32.xlu1 %v1214_v43, %s2539_s30 }
0x18e7   : > { %v1515_v44 = vpop.permute.xlu1 %1514 }
0x18e8   : > { %v1517_v45 = vmul.f32 %v1515_v44, %v1498_v21 }
0x18ea   : > { %v1519_v46 = vpack.c.bf16 %v1517_v45, %v1517_v45 }
0x18eb   : > { %v1059_v47 = vpop.permute.xlu1 %1058 }
0x18ec   : > { %1062 = vst.msk [vmem:[#allocation3 + $0x28] sm:$0xff] %vm595_vm1, %v1059_v47  ;;  %1521 = vrot.lane.b32.xlu0 %v1519_v46, %s2539_s30 }
0x18ef   : > { %v1217_v48 = vpop.permute.xlu1 %1216 }
0x18f0   : > { %1220 = vst.msk [vmem:[#allocation3 + $0x38] sm:$0xff] %vm595_vm1, %v1217_v48 }
0x18f3   : > { %v1226_v49 = vld [vmem:[#allocation3 + $0x28] sm:$0xff] }
0x18f4   : > { %v2159_v51 = vpack.c.bf16 %v1226_v49, %v1225_v14 }
0x18f6   : > { %2326 = vmatprep.mubr.msk.bf16.mxu1 %vm595_vm1, %v2159_v51 }
0x18f7   : > { %v1228_v30 = vld [vmem:[#allocation3 + $0x38] sm:$0xff] }
0x18f8   : > { %v2160_v4 = vpack.c.bf16 %v1228_v30, %v1227_v54 }
0x18fa   : > { %2327 = vmatmul.mubr.msk.bf16.gmra.mrb[28].mxu1 %vm595_vm1, %v2160_v4 }
0x18fb   : > { %2350 = vmatprep.mubr.msk.bf16.mxu1 %vm2536_vm0, %v2535_v10 }
0x195e   : > { %v1522_v52 = vpop.permute.xlu0 %1521 }
0x195f   : > { %2351 = vmatmul.mubr.msk.bf16.vlgmr.msra.gmra.mrb[32].mxu1 %vm595_vm1, %v1522_v52 }
0x1960   : > { %2363 = vmatpush3.bf16.msra.mxu1 %v2832_v29  ;;  %2366 = vmatprep.mubr.msk.bf16.mxu1 %vm2536_vm0, %v2535_v10 }
0x1961   : > { %2364 = vmatprep.subr.bf16.mxu1 %v2535_v10 }
0x1964   : > { %2365 = vmatpush3.bf16.msra.mxu1 %v2840_v31 }
0x1965   : > { %2378 = vmatprep.subr.bf16.mxu1 %v2535_v10 }
0x19cd   : > { %v2915_v34 = vpop.f32.mrb[28].mxu1 }
0x19ce   : > { %v2917_v53 = vpop.f32.mrb[29].mxu1 }
0x19cf   : > { %v2919_v55 = vpop.f32.mrb[30].mxu1  ;;  %v1343_v44 = vadd.f32 %v2869_v12, %v2917_v53 }
0x19d0   : > { %v2921_v56 = vpop.f32.mrb[31].mxu1 }
0x1a32   : > { %v1560_v58 = vpop.f32.mrb[32].mxu1 }
0x1a33   : > { %v1566_v59 = vadd.f32 %v1560_v58, %v1335_v57  ;;  %v2352_v60 = vpop.f32.mrb[33].mxu1 }
0x1a34   : > { %v1563_v61 = vpop.f32.mrb[34].mxu1 }
0x1a35   : > { %v1567_v62 = vmul.f32 0.5, %v1566_v59  ;;  %v2353_v63 = vpop.f32.mrb[35].mxu1 }
0x1a37   : > { %2487 = vtanh.f32 %v1567_v62 }
0x1a41   : > { %v2488_v1 = vpop.eup %2487 }
0x1a42   : > { %v1569_v3 = vmul.f32 0.5, %v2488_v1 }
0x1a44   : > { %v1570_v5 = vadd.f32 0.5, %v1569_v3 }
0x1a46   : > { %v1571_v6 = vmul.f32 2.0, %v1570_v5  ;;  %v1573_v2 = vmul.f32 %v1570_v5, %v1511_v41 }
0x1a48   : > { %v2136_v7 = vadd.f32 -1.0, %v1571_v6 }
0x1a4a   : > { %1575 = vrot.lane.b32.xlu1 %v2136_v7, %s2538_s18 }
0x1abc   : > { %v1576_v9 = vpop.permute.xlu1 %1575 }
0x1abd   : > { %v1578_v11 = vmul.f32 %v1576_v9, %v1570_v5 }
0x1abf   : > { %1580 = vrot.lane.b32.xlu0 %v1578_v11, %s2539_s30 }
0x1b31   : > { %v1581_v35 = vpop.permute.xlu0 %1580 }
0x1b32   : > { %v1583_v13 = vadd.f32 %v1581_v35, %v1573_v2 }
0x1b34   : > { %2489 = vtanh.f32 %v1583_v13 }
0x1b3e   : > { %v2490_v16 = vpop.eup %2489 }
0x1b3f   : > { %1586 = vrot.lane.b32.xlu1 %v2490_v16, %s2538_s18 }
0x1bb1   : > { %v1587_v17 = vpop.permute.xlu1 %1586 }
0x1bb2   : > { %v1589_v18 = vmul.f32 %v1587_v17, %v1570_v5  ;;  %v1346_v5 = vadd.f32 %v2869_v12, %v2921_v56 }
0x1bb4   : > { %v1591_v50 = vpack.c.bf16 %v1589_v18, %v1589_v18 }
0x1bb6   : > { %1593 = vrot.lane.b32.xlu0 %v1591_v50, %s2539_s30 }
0x1c28   : > { %v1594_v15 = vpop.permute.xlu0 %1593 }
0x1c29   : > { %2359 = vmatmul.mubr.msk.bf16.vlgmr.msra.gmra.mrb[24].mxu0 %vm595_vm1, %v1594_v15 }
0x1c2a   : > { %2371 = vmatpush3.bf16.msra.mxu0 %v2832_v29  ;;  %2374 = vmatprep.mubr.msk.bf16.mxu0 %vm2536_vm0, %v2535_v10 }
0x1c2b   : > { %2372 = vmatprep.subr.bf16.mxu0 %v2535_v10 }
0x1c2e   : > { %2373 = vmatpush3.bf16.msra.mxu0 %v2840_v31 }
0x1c2f   : > { %2386 = vmatprep.subr.bf16.mxu0 %v2535_v10 }
0x1cfc   : > { %v1632_v19 = vpop.f32.mrb[24].mxu0 }
0x1cfd   : > { %v1638_v22 = vadd.f32 %v1632_v19, %v1338_v36  ;;  %v2360_v23 = vpop.f32.mrb[25].mxu0 }
0x1cfe   : > { %v1635_v24 = vpop.f32.mrb[26].mxu0 }
0x1cff   : > { %v1639_v25 = vmul.f32 0.5, %v1638_v22  ;;  %v2361_v26 = vpop.f32.mrb[27].mxu0 }
0x1d00   : > { %v1351_v26 = vadd.f32 %v2915_v34, %v2869_v12 }
0x1d01   : > { %2491 = vtanh.f32 %v1639_v25 }
0x1d0b   : > { %v2492_v8 = vpop.eup %2491 }
0x1d0c   : > { %v1641_v0 = vmul.f32 0.5, %v2492_v8 }
0x1d0e   : > { %v1642_v32 = vadd.f32 0.5, %v1641_v0 }
0x1d10   : > { %v1643_v27 = vmul.f32 2.0, %v1642_v32  ;;  %v1645_v37 = vmul.f32 %v1642_v32, %v1583_v13 }
0x1d12   : > { %v2138_v21 = vadd.f32 -1.0, %v1643_v27 }
0x1d14   : > { %1647 = vrot.lane.b32.xlu1 %v2138_v21, %s2538_s18 }
0x1d86   : > { %v1648_v28 = vpop.permute.xlu1 %1647 }
0x1d87   : > { %v1650_v33 = vmul.f32 %v1648_v28, %v1642_v32 }
0x1d89   : > { %1652 = vrot.lane.b32.xlu0 %v1650_v33, %s2539_s30 }
0x1dfb   : > { %v1653_v38 = vpop.permute.xlu0 %1652 }
0x1dfc   : > { %v1655_v20 = vadd.f32 %v1653_v38, %v1645_v37 }
0x1dfe   : > { %2493 = vtanh.f32 %v1655_v20 }
0x1e08   : > { %v2494_v40 = vpop.eup %2493 }
0x1e09   : > { %1658 = vrot.lane.b32.xlu1 %v2494_v40, %s2538_s18 }
0x1e7b   : > { %v1659_v39 = vpop.permute.xlu1 %1658 }
0x1e7c   : > { %v1661_v41 = vmul.f32 %v1659_v39, %v1642_v32 }
0x1e7e   : > { %v1663_v42 = vpack.c.bf16 %v1661_v41, %v1661_v41 }
0x1e80   : > { %1665 = vrot.lane.b32.xlu0 %v1663_v42, %s2539_s30 }
0x1ef2   : > { %v1666_v43 = vpop.permute.xlu0 %1665 }
0x1ef3   : > { %2367 = vmatmul.mubr.msk.bf16.vlgmr.msra.gmra.mrb[36].mxu1 %vm595_vm1, %v1666_v43 }
0x1ef4   : > { %2379 = vmatpush3.bf16.msra.mxu1 %v2832_v29  ;;  %2382 = vmatprep.mubr.msk.bf16.mxu1 %vm2536_vm0, %v2535_v10 }
0x1ef5   : > { %2380 = vmatprep.subr.bf16.mxu1 %v2535_v10 }
0x1ef8   : > { %2381 = vmatpush3.bf16.msra.mxu1 %v2840_v31 }
0x1ef9   : > { %2394 = vmatprep.subr.bf16.mxu1 %v2535_v10 }
0x1fc6   : > { %v1704_v45 = vpop.f32.mrb[36].mxu1 }
0x1fc7   : > { %v1710_v46 = vadd.f32 %v1704_v45, %v1343_v44  ;;  %v2368_v47 = vpop.f32.mrb[37].mxu1 }
0x1fc8   : > { %v1707_v48 = vpop.f32.mrb[38].mxu1 }
0x1fc9   : > { %v1711_v14 = vmul.f32 0.5, %v1710_v46  ;;  %v2369_v49 = vpop.f32.mrb[39].mxu1 }
0x1fcb   : > { %2495 = vtanh.f32 %v1711_v14  ;;  %v1354_v14 = vadd.f32 %v2919_v55, %v2869_v12 }
0x1fd5   : > { %v2496_v51 = vpop.eup %2495 }
0x1fd6   : > { %v1713_v54 = vmul.f32 0.5, %v2496_v51 }
0x1fd8   : > { %v1714_v30 = vadd.f32 0.5, %v1713_v54 }
0x1fda   : > { %v1715_v4 = vmul.f32 2.0, %v1714_v30  ;;  %v1717_v59 = vmul.f32 %v1714_v30, %v1655_v20 }
0x1fdc   : > { %v2140_v52 = vadd.f32 -1.0, %v1715_v4 }
0x1fde   : > { %1719 = vrot.lane.b32.xlu1 %v2140_v52, %s2538_s18 }
0x2050   : > { %v1720_v57 = vpop.permute.xlu1 %1719 }
0x2051   : > { %v1722_v58 = vmul.f32 %v1720_v57, %v1714_v30 }
0x2053   : > { %1724 = vrot.lane.b32.xlu0 %v1722_v58, %s2539_s30 }
0x20c5   : > { %v1725_v53 = vpop.permute.xlu0 %1724 }
0x20c6   : > { %v1727_v60 = vadd.f32 %v1725_v53, %v1717_v59 }
0x20c8   : > { %2497 = vtanh.f32 %v1727_v60 }
0x20d2   : > { %v2498_v61 = vpop.eup %2497 }
0x20d3   : > { %1730 = vrot.lane.b32.xlu1 %v2498_v61, %s2538_s18 }
0x2145   : > { %v1731_v62 = vpop.permute.xlu1 %1730 }
0x2146   : > { %v1733_v63 = vmul.f32 %v1731_v62, %v1714_v30 }
0x2148   : > { %v1735_v1 = vpack.c.bf16 %v1733_v63, %v1733_v63 }
0x214a   : > { %1737 = vrot.lane.b32.xlu0 %v1735_v1, %s2539_s30  ;;  %v2445_v1 = vld [vmem:[%s3018_s7] sm:$0xff]  }
0x21bc   : > { %v1738_v3 = vpop.permute.xlu0 %1737 }
0x21bd   : > { %2375 = vmatmul.mubr.msk.bf16.vlgmr.msra.gmra.mrb[28].mxu0 %vm595_vm1, %v1738_v3  ;;  %v2446_v3 = vld [vmem:[%s3018_s7 + $0x8] sm:$0xff]  }
0x21be   : > { %2387 = vmatpush3.bf16.msra.mxu0 %v2832_v29  ;;  %2390 = vmatprep.mubr.msk.bf16.mxu0 %vm2536_vm0, %v2535_v10 }
0x21bf   : > { %2388 = vmatprep.subr.bf16.mxu0 %v2535_v10 }
0x21c2   : > { %2389 = vmatpush3.bf16.msra.mxu0 %v2840_v31 }
0x2290   : > { %v1776_v6 = vpop.f32.mrb[28].mxu0 }
0x2291   : > { %v1782_v7 = vadd.f32 %v1776_v6, %v1346_v5  ;;  %v2376_v9 = vpop.f32.mrb[29].mxu0 }
0x2292   : > { %v1779_v11 = vpop.f32.mrb[30].mxu0 }
0x2293   : > { %v1783_v2 = vmul.f32 0.5, %v1782_v7  ;;  %v2377_v35 = vpop.f32.mrb[31].mxu0 }
0x2295   : > { %2499 = vtanh.f32 %v1783_v2 }
0x229f   : > { %v2500_v13 = vpop.eup %2499 }
0x22a0   : > { %v1785_v16 = vmul.f32 0.5, %v2500_v13 }
0x22a2   : > { %v1786_v29 = vadd.f32 0.5, %v1785_v16 }
0x22a4   : > { %v1787_v17 = vmul.f32 2.0, %v1786_v29  ;;  %v1789_v31 = vmul.f32 %v1786_v29, %v1727_v60 }
0x22a6   : > { %v2142_v18 = vadd.f32 -1.0, %v1787_v17 }
0x22a8   : > { %1791 = vrot.lane.b32.xlu1 %v2142_v18, %s2538_s18 }
0x231a   : > { %v1792_v50 = vpop.permute.xlu1 %1791 }
0x231b   : > { %v1794_v15 = vmul.f32 %v1792_v50, %v1786_v29 }
0x231d   : > { %1796 = vrot.lane.b32.xlu0 %v1794_v15, %s2539_s30 }
0x238f   : > { %v1797_v56 = vpop.permute.xlu0 %1796 }
0x2390   : > { %v1799_v36 = vadd.f32 %v1797_v56, %v1789_v31 }
0x2392   : > { %2501 = vtanh.f32 %v1799_v36 }
0x239c   : > { %v2502_v19 = vpop.eup %2501 }
0x239d   : > { %1802 = vrot.lane.b32.xlu1 %v2502_v19, %s2538_s18 }
0x240f   : > { %v1803_v22 = vpop.permute.xlu1 %1802 }
0x2410   : > { %v1805_v23 = vmul.f32 %v1803_v22, %v1786_v29 }
0x2412   : > { %v1807_v24 = vpack.c.bf16 %v1805_v23, %v1805_v23 }
0x2414   : > { %1809 = vrot.lane.b32.xlu0 %v1807_v24, %s2539_s30 }
0x2486   : > { %v1810_v25 = vpop.permute.xlu0 %1809 }
0x2487   : > { %2383 = vmatmul.mubr.msk.bf16.vlgmr.msra.gmra.mrb[40].mxu1 %vm595_vm1, %v1810_v25 }
0x2488   : > { %2398 = vmatprep.mubr.msk.bf16.mxu1 %vm2536_vm0, %v2535_v10  ;;  %2395 = vmatpush3.bf16.msra.mxu1 %v2445_v1 }
0x2489   : > { %2396 = vmatprep.subr.bf16.mxu1 %v2535_v10  ;;  %v2147_v10 = vld [vmem:[%s3019_s8] ss:$0 sm:$0xff] }
0x248c   : > { %2397 = vmatpush3.bf16.msra.mxu1 %v2446_v3 }
0x255a   : > { %v1848_v8 = vpop.f32.mrb[40].mxu1 }
0x255b   : > { %v1854_v0 = vadd.f32 %v1848_v8, %v1351_v26  ;;  %v2384_v32 = vpop.f32.mrb[41].mxu1 }
0x255c   : > { %v1851_v27 = vpop.f32.mrb[42].mxu1 }
0x255d   : > { %v1855_v21 = vmul.f32 0.5, %v1854_v0  ;;  %v2385_v28 = vpop.f32.mrb[43].mxu1 }
0x255f   : > { %2503 = vtanh.f32 %v1855_v21 }
0x2569   : > { %v2504_v33 = vpop.eup %2503 }
0x256a   : > { %v1857_v37 = vmul.f32 0.5, %v2504_v33 }
0x256c   : > { %v1858_v38 = vadd.f32 0.5, %v1857_v37 }
0x256e   : > { %v1859_v20 = vmul.f32 2.0, %v1858_v38  ;;  %v1861_v42 = vmul.f32 %v1858_v38, %v1799_v36 }
0x2570   : > { %v2144_v40 = vadd.f32 -1.0, %v1859_v20 }
0x2572   : > { %1863 = vrot.lane.b32.xlu1 %v2144_v40, %s2538_s18 }
0x25e4   : > { %v1864_v39 = vpop.permute.xlu1 %1863 }
0x25e5   : > { %v1866_v41 = vmul.f32 %v1864_v39, %v1858_v38 }
0x25e7   : > { %1868 = vrot.lane.b32.xlu0 %v1866_v41, %s2539_s30 }
0x2659   : > { %v1869_v34 = vpop.permute.xlu0 %1868 }
0x265a   : > { %v1871_v43 = vadd.f32 %v1869_v34, %v1861_v42 }
0x265c   : > { %2505 = vtanh.f32 %v1871_v43 }
0x2666   : > { %v2506_v44 = vpop.eup %2505 }
0x2667   : > { %1874 = vrot.lane.b32.xlu1 %v2506_v44, %s2538_s18 }
0x26d9   : > { %v1875_v45 = vpop.permute.xlu1 %1874 }
0x26da   : > { %v1877_v46 = vmul.f32 %v1875_v45, %v1858_v38 }
0x26dc   : > { %v1879_v47 = vpack.c.bf16 %v1877_v46, %v1877_v46 }
0x26de   : > { %1881 = vrot.lane.b32.xlu0 %v1879_v47, %s2539_s30 }
0x2750   : > { %v1882_v48 = vpop.permute.xlu0 %1881 }
0x2751   : > { %2391 = vmatmul.mubr.msk.bf16.vlgmr.msra.gmra.mrb[32].mxu0 %vm595_vm1, %v1882_v48 }
0x2824   : > { %v1920_v49 = vpop.f32.mrb[32].mxu0 }
0x2825   : > { %v1926_v51 = vadd.f32 %v1920_v49, %v1354_v14  ;;  %v2392_v54 = vpop.f32.mrb[33].mxu0 }
0x2826   : > { %v1923_v30 = vpop.f32.mrb[34].mxu0 }
0x2827   : > { %v1927_v4 = vmul.f32 0.5, %v1926_v51  ;;  %v2393_v52 = vpop.f32.mrb[35].mxu0 }
0x2829   : > { %2507 = vtanh.f32 %v1927_v4 }
0x2833   : > { %v2508_v57 = vpop.eup %2507 }
0x2834   : > { %v1929_v58 = vmul.f32 0.5, %v2508_v57 }
0x2836   : > { %v1930_v59 = vadd.f32 0.5, %v1929_v58 }
0x2838   : > { %v1931_v53 = vmul.f32 2.0, %v1930_v59  ;;  %v1933_v63 = vmul.f32 %v1930_v59, %v1871_v43 }
0x283a   : > { %v2146_v60 = vadd.f32 -1.0, %v1931_v53 }
0x283c   : > { %1935 = vrot.lane.b32.xlu1 %v2146_v60, %s2538_s18 }
0x28ae   : > { %v1936_v61 = vpop.permute.xlu1 %1935 }
0x28af   : > { %v1938_v62 = vmul.f32 %v1936_v61, %v1930_v59 }
0x28b1   : > { %1940 = vrot.lane.b32.xlu0 %v1938_v62, %s2539_s30 }
0x2923   : > { %v1941_v12 = vpop.permute.xlu0 %1940 }
0x2924   : > { %v1943_v55 = vadd.f32 %v1941_v12, %v1933_v63 }
0x2926   : > { %2509 = vtanh.f32 %v1943_v55 }
0x2930   : > { %v2510_v5 = vpop.eup %2509 }
0x2931   : > { %1946 = vrot.lane.b32.xlu1 %v2510_v5, %s2538_s18  ;;  %s392_s18 = scalar_lea.vmem %s3020_s9, %s2088_s19 }
0x29a3   : > { %v1947_v6 = vpop.permute.xlu1 %1946 }
0x29a4   : > { %v1949_v7 = vmul.f32 %v1947_v6, %v1930_v59 }
0x29a6   : > { %v1950_v9 = vpack.c.bf16 %v1949_v7, %v1949_v7 }
0x29a8   : > { %1963 = vrot.lane.b32.xlu0 %v1950_v9, %s2539_s30 }
0x2a1a   : > { %v1964_v11 = vpop.permute.xlu0 %1963 }
0x2a1b   : > { %2399 = vmatmul.mubr.msk.bf16.vlgmr.msra.gmra.mrb[44].mxu1 %vm595_vm1, %v1964_v11 }
0x2aee   : > { %v2014_v2 = vpop.f32.mrb[44].mxu1 }
0x2aef   : > { %v2015_v35 = vadd.f32 %v2147_v10, %v2014_v2  ;;  %v2400_v13 = vpop.f32.mrb[45].mxu1 }
0x2af0   : > { %v2017_v16 = vpop.f32.mrb[46].mxu1 }
0x2af1   : > { %2020 = vst [vmem:[%s392_s18] sm:$0xff] %v2015_v35  ;;  %v2401_v29 = vpop.f32.mrb[47].mxu1 }
0x2af2 PF: > { %p16_p9 = scmp.ge.s32.totalorder %s2607_s13, 4   ;;  %s3021_s30 = smov %s2529_s10 }
0x2af3   : > { %s3022_s10 = smov %s2616_s16  ;;  %s3023_s11 = smov %s2607_s13 }
0x2af4   :  { %18 = sbr.rel (!%p16_p9) target bundleno = 2 (0x2), region = 143 }

</bundles_post_ra>
